<compile_context>
chip_gen: v7x
topology: tpu7x:2x2x1
jax: 0.10.0
libtpu: 0.0.40
codegen_flags: <defaults>
</compile_context>

<pallas_src>
import functools

import jax
import jax.numpy as jnp
from jax.experimental import pallas as pl
from jax.experimental.pallas import tpu as pltpu


# ------------------------------ fused kernel --------------------------------

def _bert_fused_kernel(
    # activations / data
    emb_ref, mask_ref, onehot_ref,
    # stacked encoder-layer weights (leading dim = num_layers)
    qkv_w_ref, qkv_b_ref, o_w_ref, o_b_ref, ln1_g_ref, ln1_b_ref,
    i_w_ref, i_b_ref, d_w_ref, d_b_ref, ln2_g_ref, ln2_b_ref,
    # embedding LayerNorm
    emb_ln_g_ref, emb_ln_b_ref,
    # pooler + classification head
    pool_w_ref, pool_b_ref, fc1_w_ref, fc1_b_ref, fc2_w_ref, fc2_b_ref,
    out_w_ref, out_b_ref,
    # outputs
    logits_ref, loss_ref,
    *, num_layers, batch, seq, hidden, num_heads, eps,
):
    B, S, H = batch, seq, hidden
    nh = num_heads
    dh = H // nh
    scale = 1.0 / float(dh) ** 0.5
    cdt = jnp.bfloat16   # MXU input dtype (native on v5e/v6e/v7x)
    f32 = jnp.float32

    def layernorm(x, g, b):
        mean = jnp.mean(x, axis=-1, keepdims=True)
        xc = x - mean
        var = jnp.mean(xc * xc, axis=-1, keepdims=True)
        return xc * jax.lax.rsqrt(var + eps) * g + b

    def dense(x, w, b, act=None):
        # bf16 MXU matmul, f32 accumulation + f32 epilogue.
        y = jnp.dot(x.astype(cdt), w, preferred_element_type=f32) + b
        if act == "relu":
            y = jnp.maximum(y, 0.0)
        elif act == "tanh":
            y = jnp.tanh(y)
        elif act == "gelu":
            # TODO(synk): HF BERT default is the exact erf GELU; tanh
            # approximation used (erf has no guaranteed Mosaic lowering).
            y = 0.5 * y * (1.0 + jnp.tanh(0.7978845608028654 *
                                          (y + 0.044715 * y * y * y)))
        return y

    # --- embedding LayerNorm (no residual, no zero-tensor read) ---
    x = layernorm(emb_ref[...], emb_ln_g_ref[...], emb_ln_b_ref[...])   # (B*S, H)

    # additive attention mask built once from the raw (B, S) mask
    neg_mask = (1.0 - mask_ref[...]) * -1e9                             # (B, S)

    # --- transformer encoder (num_layers is static -> Python unrolled) ---
    for l in range(num_layers):
        # fused QKV projection: one MXU pass with N = 3H
        qkv = dense(x, qkv_w_ref[l], qkv_b_ref[l])                      # (B*S, 3H)

        ctx_heads = []
        for h in range(nh):
            qh = qkv[:, h * dh:(h + 1) * dh].reshape(B, S, dh)
            kh = qkv[:, H + h * dh:H + (h + 1) * dh].reshape(B, S, dh)
            vh = qkv[:, 2 * H + h * dh:2 * H + (h + 1) * dh].reshape(B, S, dh)
            # scores: contract last dims directly (no explicit K transpose)
            s = jnp.einsum("bqd,bkd->bqk", qh.astype(cdt), kh.astype(cdt),
                           preferred_element_type=f32) * scale          # (B, S, S)
            s = s + neg_mask[:, None, :]
            s = s - jnp.max(s, axis=-1, keepdims=True)
            p = jnp.exp(s)
            p = p * pl.reciprocal(jnp.sum(p, axis=-1, keepdims=True), approx=True)
            ch = jnp.einsum("bqk,bkd->bqd", p.astype(cdt), vh.astype(cdt),
                            preferred_element_type=f32)                 # (B, S, dh)
            ctx_heads.append(ch.reshape(B * S, dh))
        ctx = jnp.concatenate(ctx_heads, axis=-1)                       # (B*S, H)

        attn_out = dense(ctx, o_w_ref[l], o_b_ref[l])
        x = layernorm(attn_out + x, ln1_g_ref[l], ln1_b_ref[l])

        ffn = dense(x, i_w_ref[l], i_b_ref[l], act="gelu")
        ffn_out = dense(ffn, d_w_ref[l], d_b_ref[l])
        x = layernorm(ffn_out + x, ln2_g_ref[l], ln2_b_ref[l])

    # --- BERT pooler: tanh(W @ [CLS] + b) ---
    cls = x.reshape(B, S, H)[:, 0, :]                                   # (B, H)
    pooled = dense(cls, pool_w_ref[...], pool_b_ref[...], act="tanh")

    # --- classification head (dropouts are identity in eval mode) ---
    h1 = dense(pooled, fc1_w_ref[...], fc1_b_ref[...], act="relu")
    h2 = dense(h1, fc2_w_ref[...], fc2_b_ref[...], act="relu")
    logits = dense(h2, out_w_ref[...], out_b_ref[...])                  # (B, num_labels)
    logits_ref[...] = logits.astype(logits_ref.dtype)

    # --- cross-entropy loss (mean over batch) ---
    z = logits - jnp.max(logits, axis=-1, keepdims=True)
    lse = jnp.log(jnp.sum(jnp.exp(z), axis=-1, keepdims=True))
    nll = -jnp.sum(onehot_ref[...] * (z - lse), axis=-1, keepdims=True)  # (B, 1)
    loss_ref[...] = jnp.sum(nll, axis=0, keepdims=True) * (1.0 / B)


def _full_spec(x):
    nd = x.ndim
    return pl.BlockSpec(x.shape, lambda i, _nd=nd: (0,) * _nd)


# ------------------------------ model wrapper -------------------------------

CFG = dict(
    vocab_size=100,
    max_position=16,
    type_vocab=2,
    hidden=32,        # "bert_hidden_size"
    num_heads=2,
    intermediate=64,
    num_layers=2,
    num_labels=2,
    seq=8,
    batch=2,
)


def init_params(key, cfg):
    H = cfg["hidden"]
    I = cfg["intermediate"]
    L = cfg["num_layers"]
    h1 = H // 2
    h2 = H // 4

    keys = iter(jax.random.split(key, 32))

    def w(shape, scale=0.02):
        return scale * jax.random.normal(next(keys), shape, dtype=jnp.float32)

    return {
        "word_emb": w((cfg["vocab_size"], H)),
        "pos_emb": w((cfg["max_position"], H)),
        "type_emb": w((cfg["type_vocab"], H)),
        "emb_ln_g": jnp.ones((1, H), jnp.float32),
        "emb_ln_b": jnp.zeros((1, H), jnp.float32),
        # stacked per-layer weights; q/k/v fused into one (H, 3H) projection
        "qkv_w": w((L, H, 3 * H)), "qkv_b": jnp.zeros((L, 1, 3 * H), jnp.float32),
        "o_w": w((L, H, H)), "o_b": jnp.zeros((L, 1, H), jnp.float32),
        "ln1_g": jnp.ones((L, 1, H), jnp.float32), "ln1_b": jnp.zeros((L, 1, H), jnp.float32),
        "i_w": w((L, H, I)), "i_b": jnp.zeros((L, 1, I), jnp.float32),
        "d_w": w((L, I, H)), "d_b": jnp.zeros((L, 1, H), jnp.float32),
        "ln2_g": jnp.ones((L, 1, H), jnp.float32), "ln2_b": jnp.zeros((L, 1, H), jnp.float32),
        "pool_w": w((H, H)), "pool_b": jnp.zeros((1, H), jnp.float32),
        "fc1_w": w((H, h1)), "fc1_b": jnp.zeros((1, h1), jnp.float32),
        "fc2_w": w((h1, h2)), "fc2_b": jnp.zeros((1, h2), jnp.float32),
        "out_w": w((h2, cfg["num_labels"])), "out_b": jnp.zeros((1, cfg["num_labels"]), jnp.float32),
    }


def bert_pair_classifier_forward(params, input_ids, attention_mask,
                                 token_type_ids, labels=None, cfg=CFG):
    B, S = input_ids.shape
    H = cfg["hidden"]
    nh = cfg["num_heads"]
    L = cfg["num_layers"]
    NL = cfg["num_labels"]

    # --- plain-JAX glue: embedding gathers + segment/position sums ---
    tok = jnp.take(params["word_emb"], input_ids, axis=0)                 # (B,S,H)
    pos = params["pos_emb"][:S][None, :, :]                               # (1,S,H)
    typ = jnp.take(params["type_emb"], token_type_ids, axis=0)            # (B,S,H)
    emb = (tok + pos + typ).reshape(B * S, H).astype(jnp.float32)

    mask_f = attention_mask.astype(jnp.float32)                           # (B,S)
    if labels is None:
        onehot = jnp.zeros((B, NL), jnp.float32)
    else:
        onehot = jax.nn.one_hot(labels, NL, dtype=jnp.float32)

    bf = lambda a: a.astype(jnp.bfloat16)   # bf16 weights at the kernel boundary
    args = (
        emb, mask_f, onehot,
        bf(params["qkv_w"]), params["qkv_b"],
        bf(params["o_w"]), params["o_b"],
        params["ln1_g"], params["ln1_b"],
        bf(params["i_w"]), params["i_b"],
        bf(params["d_w"]), params["d_b"],
        params["ln2_g"], params["ln2_b"],
        params["emb_ln_g"], params["emb_ln_b"],
        bf(params["pool_w"]), params["pool_b"],
        bf(params["fc1_w"]), params["fc1_b"],
        bf(params["fc2_w"]), params["fc2_b"],
        bf(params["out_w"]), params["out_b"],
    )

    kernel = functools.partial(
        _bert_fused_kernel,
        num_layers=L, batch=B, seq=S, hidden=H, num_heads=nh, eps=1e-12,
    )

    logits, loss = pl.pallas_call(
        kernel,
        out_shape=(jax.ShapeDtypeStruct((B, NL), jnp.float32),
                   jax.ShapeDtypeStruct((1, 1), jnp.float32)),
        grid=(1,),
        in_specs=[_full_spec(a) for a in args],
        out_specs=(pl.BlockSpec((B, NL), lambda i: (0, 0)),
                   pl.BlockSpec((1, 1), lambda i: (0, 0))),
        compiler_params=pltpu.CompilerParams(
            dimension_semantics=("arbitrary",)),
    )(*args)

    if labels is None:
        return None, logits
    return loss[0, 0], logits


# --------------------------------- main --------------------------------------

if __name__ == "__main__":
    key = jax.random.PRNGKey(0)
    k_param, k_ids = jax.random.split(key)

    params = init_params(k_param, CFG)

    B, S = CFG["batch"], CFG["seq"]
    input_ids = jax.random.randint(k_ids, (B, S), 0, CFG["vocab_size"], dtype=jnp.int32)
    attention_mask = jnp.ones((B, S), dtype=jnp.int32).at[1, -2:].set(0)
    # text pair: first half is sentence A (segment 0), second half sentence B (segment 1)
    token_type_ids = jnp.broadcast_to(
        (jnp.arange(S)[None, :] >= (S // 2)).astype(jnp.int32), (B, S))
    labels = jnp.array([0, 1], dtype=jnp.int32)

    loss, logits = bert_pair_classifier_forward(
        params, input_ids, attention_mask, token_type_ids, labels)
    jax.block_until_ready((loss, logits))

    assert logits.shape == (B, CFG["num_labels"])
    assert loss.shape == ()
    assert bool(jnp.isfinite(loss)) and bool(jnp.all(jnp.isfinite(logits)))
    print("KERNEL_OK")
</pallas_src>

<mosaic_0001>
module attributes {stable_mosaic.version = 11 : i64} {
  func.func @_bert_fused_kernel(%arg0: i32, %arg1: memref<16x32xf32, #tpu.memory_space<vmem>>, %arg2: memref<2x8xf32, #tpu.memory_space<vmem>>, %arg3: memref<2x2xf32, #tpu.memory_space<vmem>>, %arg4: memref<2x32x96xbf16, #tpu.memory_space<vmem>>, %arg5: memref<2x1x96xf32, #tpu.memory_space<vmem>>, %arg6: memref<2x32x32xbf16, #tpu.memory_space<vmem>>, %arg7: memref<2x1x32xf32, #tpu.memory_space<vmem>>, %arg8: memref<2x1x32xf32, #tpu.memory_space<vmem>>, %arg9: memref<2x1x32xf32, #tpu.memory_space<vmem>>, %arg10: memref<2x32x64xbf16, #tpu.memory_space<vmem>>, %arg11: memref<2x1x64xf32, #tpu.memory_space<vmem>>, %arg12: memref<2x64x32xbf16, #tpu.memory_space<vmem>>, %arg13: memref<2x1x32xf32, #tpu.memory_space<vmem>>, %arg14: memref<2x1x32xf32, #tpu.memory_space<vmem>>, %arg15: memref<2x1x32xf32, #tpu.memory_space<vmem>>, %arg16: memref<1x32xf32, #tpu.memory_space<vmem>>, %arg17: memref<1x32xf32, #tpu.memory_space<vmem>>, %arg18: memref<32x32xbf16, #tpu.memory_space<vmem>>, %arg19: memref<1x32xf32, #tpu.memory_space<vmem>>, %arg20: memref<32x16xbf16, #tpu.memory_space<vmem>>, %arg21: memref<1x16xf32, #tpu.memory_space<vmem>>, %arg22: memref<16x8xbf16, #tpu.memory_space<vmem>>, %arg23: memref<1x8xf32, #tpu.memory_space<vmem>>, %arg24: memref<8x2xbf16, #tpu.memory_space<vmem>>, %arg25: memref<1x2xf32, #tpu.memory_space<vmem>>, %arg26: memref<2x2xf32, #tpu.memory_space<vmem>>, %arg27: memref<1x1xf32, #tpu.memory_space<vmem>>) attributes {dimension_semantics = [#tpu.dimension_semantics<arbitrary>], iteration_bounds = array<i64: 1>, scalar_prefetch = 0 : i64, scratch_operands = 0 : i64, tpu.core_type = #tpu.core_type<tc>, window_params = [{pipeline_mode = #tpu.pipeline_mode<synchronous>, transform_indices = @transform_0, window_bounds = array<i64: 16, 32>}, {pipeline_mode = #tpu.pipeline_mode<synchronous>, transform_indices = @transform_1, window_bounds = array<i64: 2, 8>}, {pipeline_mode = #tpu.pipeline_mode<synchronous>, transform_indices = @transform_2, window_bounds = array<i64: 2, 2>}, {pipeline_mode = #tpu.pipeline_mode<synchronous>, transform_indices = @transform_3, window_bounds = array<i64: 2, 32, 96>}, {pipeline_mode = #tpu.pipeline_mode<synchronous>, transform_indices = @transform_4, window_bounds = array<i64: 2, 1, 96>}, {pipeline_mode = #tpu.pipeline_mode<synchronous>, transform_indices = @transform_5, window_bounds = array<i64: 2, 32, 32>}, {pipeline_mode = #tpu.pipeline_mode<synchronous>, transform_indices = @transform_6, window_bounds = array<i64: 2, 1, 32>}, {pipeline_mode = #tpu.pipeline_mode<synchronous>, transform_indices = @transform_7, window_bounds = array<i64: 2, 1, 32>}, {pipeline_mode = #tpu.pipeline_mode<synchronous>, transform_indices = @transform_8, window_bounds = array<i64: 2, 1, 32>}, {pipeline_mode = #tpu.pipeline_mode<synchronous>, transform_indices = @transform_9, window_bounds = array<i64: 2, 32, 64>}, {pipeline_mode = #tpu.pipeline_mode<synchronous>, transform_indices = @transform_10, window_bounds = array<i64: 2, 1, 64>}, {pipeline_mode = #tpu.pipeline_mode<synchronous>, transform_indices = @transform_11, window_bounds = array<i64: 2, 64, 32>}, {pipeline_mode = #tpu.pipeline_mode<synchronous>, transform_indices = @transform_12, window_bounds = array<i64: 2, 1, 32>}, {pipeline_mode = #tpu.pipeline_mode<synchronous>, transform_indices = @transform_13, window_bounds = array<i64: 2, 1, 32>}, {pipeline_mode = #tpu.pipeline_mode<synchronous>, transform_indices = @transform_14, window_bounds = array<i64: 2, 1, 32>}, {pipeline_mode = #tpu.pipeline_mode<synchronous>, transform_indices = @transform_15, window_bounds = array<i64: 1, 32>}, {pipeline_mode = #tpu.pipeline_mode<synchronous>, transform_indices = @transform_16, window_bounds = array<i64: 1, 32>}, {pipeline_mode = #tpu.pipeline_mode<synchronous>, transform_indices = @transform_17, window_bounds = array<i64: 32, 32>}, {pipeline_mode = #tpu.pipeline_mode<synchronous>, transform_indices = @transform_18, window_bounds = array<i64: 1, 32>}, {pipeline_mode = #tpu.pipeline_mode<synchronous>, transform_indices = @transform_19, window_bounds = array<i64: 32, 16>}, {pipeline_mode = #tpu.pipeline_mode<synchronous>, transform_indices = @transform_20, window_bounds = array<i64: 1, 16>}, {pipeline_mode = #tpu.pipeline_mode<synchronous>, transform_indices = @transform_21, window_bounds = array<i64: 16, 8>}, {pipeline_mode = #tpu.pipeline_mode<synchronous>, transform_indices = @transform_22, window_bounds = array<i64: 1, 8>}, {pipeline_mode = #tpu.pipeline_mode<synchronous>, transform_indices = @transform_23, window_bounds = array<i64: 8, 2>}, {pipeline_mode = #tpu.pipeline_mode<synchronous>, transform_indices = @transform_24, window_bounds = array<i64: 1, 2>}, {pipeline_mode = #tpu.pipeline_mode<synchronous>, transform_indices = @transform_25, window_bounds = array<i64: 2, 2>}, {pipeline_mode = #tpu.pipeline_mode<synchronous>, transform_indices = @transform_26, window_bounds = array<i64: 1, 1>}]} {
    %c0 = arith.constant 0 : index
    %c0_0 = arith.constant 0 : index
    %0 = vector.load %arg1[%c0, %c0_0] : memref<16x32xf32, #tpu.memory_space<vmem>>, vector<16x32xf32>
    %c0_1 = arith.constant 0 : index
    %c0_2 = arith.constant 0 : index
    %1 = vector.load %arg16[%c0_1, %c0_2] : memref<1x32xf32, #tpu.memory_space<vmem>>, vector<1x32xf32>
    %c0_3 = arith.constant 0 : index
    %c0_4 = arith.constant 0 : index
    %2 = vector.load %arg17[%c0_3, %c0_4] : memref<1x32xf32, #tpu.memory_space<vmem>>, vector<1x32xf32>
    %cst = arith.constant dense<0.000000e+00> : vector<16xf32>
    %3 = vector.multi_reduction <add>, %0, %cst [1] : vector<16x32xf32> to vector<16xf32>
    %4 = vector.shape_cast %3 : vector<16xf32> to vector<16x1xf32>
    %cst_5 = arith.constant 3.200000e+01 : f32
    %5 = vector.broadcast %cst_5 : f32 to vector<16x1xf32>
    %6 = arith.divf %4, %5 : vector<16x1xf32>
    %7 = vector.broadcast %6 : vector<16x1xf32> to vector<16x32xf32>
    %8 = arith.subf %0, %7 : vector<16x32xf32>
    %9 = arith.mulf %8, %8 : vector<16x32xf32>
    %cst_6 = arith.constant dense<0.000000e+00> : vector<16xf32>
    %10 = vector.multi_reduction <add>, %9, %cst_6 [1] : vector<16x32xf32> to vector<16xf32>
    %11 = vector.shape_cast %10 : vector<16xf32> to vector<16x1xf32>
    %cst_7 = arith.constant 3.200000e+01 : f32
    %12 = vector.broadcast %cst_7 : f32 to vector<16x1xf32>
    %13 = arith.divf %11, %12 : vector<16x1xf32>
    %cst_8 = arith.constant 9.99999996E-13 : f32
    %14 = vector.broadcast %cst_8 : f32 to vector<16x1xf32>
    %15 = arith.addf %13, %14 : vector<16x1xf32>
    %16 = math.rsqrt %15 : vector<16x1xf32>
    %17 = vector.broadcast %16 : vector<16x1xf32> to vector<16x32xf32>
    %18 = arith.mulf %8, %17 : vector<16x32xf32>
    %19 = vector.broadcast %1 : vector<1x32xf32> to vector<16x32xf32>
    %20 = arith.mulf %18, %19 : vector<16x32xf32>
    %21 = vector.broadcast %2 : vector<1x32xf32> to vector<16x32xf32>
    %22 = arith.addf %20, %21 : vector<16x32xf32>
    %c0_9 = arith.constant 0 : index
    %c0_10 = arith.constant 0 : index
    %23 = vector.load %arg2[%c0_9, %c0_10] : memref<2x8xf32, #tpu.memory_space<vmem>>, vector<2x8xf32>
    %cst_11 = arith.constant 1.000000e+00 : f32
    %24 = vector.broadcast %cst_11 : f32 to vector<2x8xf32>
    %25 = arith.subf %24, %23 : vector<2x8xf32>
    %cst_12 = arith.constant -1.000000e+09 : f32
    %26 = vector.broadcast %cst_12 : f32 to vector<2x8xf32>
    %27 = arith.mulf %25, %26 : vector<2x8xf32>
    %c0_13 = arith.constant 0 : index
    %c0_14 = arith.constant 0 : index
    %c0_15 = arith.constant 0 : index
    %28 = vector.load %arg4[%c0_13, %c0_14, %c0_15] : memref<2x32x96xbf16, #tpu.memory_space<vmem>>, vector<1x32x96xbf16>
    %29 = vector.shape_cast %28 : vector<1x32x96xbf16> to vector<32x96xbf16>
    %c0_16 = arith.constant 0 : index
    %c0_17 = arith.constant 0 : index
    %c0_18 = arith.constant 0 : index
    %30 = vector.load %arg5[%c0_16, %c0_17, %c0_18] : memref<2x1x96xf32, #tpu.memory_space<vmem>>, vector<1x1x96xf32>
    %31 = vector.shape_cast %30 : vector<1x1x96xf32> to vector<1x96xf32>
    %32 = arith.truncf %22 : vector<16x32xf32> to vector<16x32xbf16>
    %cst_19 = arith.constant dense<0.000000e+00> : vector<16x96xf32>
    %33 = tpu.matmul %32, %29, %cst_19 {dimension_numbers = #tpu.dot_dimension_numbers<[1], [0], [0], [1], [0, 0, 1, 1], [], []>} : vector<16x32xbf16>, vector<32x96xbf16>, vector<16x96xf32> -> vector<16x96xf32>
    %34 = vector.broadcast %31 : vector<1x96xf32> to vector<16x96xf32>
    %35 = arith.addf %33, %34 : vector<16x96xf32>
    %36 = vector.extract_strided_slice %35 {offsets = [0, 0], sizes = [16, 16], strides = [1, 1]} : vector<16x96xf32> to vector<16x16xf32>
    %37 = vector.shape_cast %36 : vector<16x16xf32> to vector<2x8x16xf32>
    %38 = vector.extract_strided_slice %35 {offsets = [0, 32], sizes = [16, 16], strides = [1, 1]} : vector<16x96xf32> to vector<16x16xf32>
    %39 = vector.shape_cast %38 : vector<16x16xf32> to vector<2x8x16xf32>
    %40 = vector.extract_strided_slice %35 {offsets = [0, 64], sizes = [16, 16], strides = [1, 1]} : vector<16x96xf32> to vector<16x16xf32>
    %41 = vector.shape_cast %40 : vector<16x16xf32> to vector<2x8x16xf32>
    %42 = arith.truncf %37 : vector<2x8x16xf32> to vector<2x8x16xbf16>
    %43 = arith.truncf %39 : vector<2x8x16xf32> to vector<2x8x16xbf16>
    "tpu.trace_start"() <{level = 10 : i32, message = "bqd,bkd->bqk"}> : () -> ()
    %cst_20 = arith.constant dense<0.000000e+00> : vector<2x8x8xf32>
    %44 = tpu.matmul %42, %43, %cst_20 {dimension_numbers = #tpu.dot_dimension_numbers<[2], [2], [1], [1], [0, 0, 0, 1, 1, 1], [0], [0]>} : vector<2x8x16xbf16>, vector<2x8x16xbf16>, vector<2x8x8xf32> -> vector<2x8x8xf32>
    "tpu.trace_stop"() : () -> ()
    %cst_21 = arith.constant 2.500000e-01 : f32
    %45 = vector.broadcast %cst_21 : f32 to vector<2x8x8xf32>
    %46 = arith.mulf %44, %45 : vector<2x8x8xf32>
    %47 = vector.shape_cast %27 : vector<2x8xf32> to vector<2x1x8xf32>
    %48 = vector.broadcast %47 : vector<2x1x8xf32> to vector<2x8x8xf32>
    %49 = arith.addf %46, %48 : vector<2x8x8xf32>
    %cst_22 = arith.constant dense<0xFF800000> : vector<2x8xf32>
    %50 = vector.multi_reduction <maximumf>, %49, %cst_22 [2] : vector<2x8x8xf32> to vector<2x8xf32>
    %51 = vector.shape_cast %50 : vector<2x8xf32> to vector<2x8x1xf32>
    %52 = vector.broadcast %51 : vector<2x8x1xf32> to vector<2x8x8xf32>
    %53 = arith.subf %49, %52 : vector<2x8x8xf32>
    %54 = math.exp %53 : vector<2x8x8xf32>
    %cst_23 = arith.constant dense<0.000000e+00> : vector<2x8xf32>
    %55 = vector.multi_reduction <add>, %54, %cst_23 [2] : vector<2x8x8xf32> to vector<2x8xf32>
    %56 = vector.shape_cast %55 : vector<2x8xf32> to vector<2x8x1xf32>
    %57 = tpu.reciprocal %56 {approx = true} : vector<2x8x1xf32> -> vector<2x8x1xf32>
    %58 = vector.broadcast %57 : vector<2x8x1xf32> to vector<2x8x8xf32>
    %59 = arith.mulf %54, %58 : vector<2x8x8xf32>
    %60 = arith.truncf %59 : vector<2x8x8xf32> to vector<2x8x8xbf16>
    %61 = arith.truncf %41 : vector<2x8x16xf32> to vector<2x8x16xbf16>
    "tpu.trace_start"() <{level = 10 : i32, message = "bqk,bkd->bqd"}> : () -> ()
    %cst_24 = arith.constant dense<0.000000e+00> : vector<2x8x16xf32>
    %62 = tpu.matmul %60, %61, %cst_24 {dimension_numbers = #tpu.dot_dimension_numbers<[2], [1], [1], [2], [0, 0, 0, 1, 1, 2], [0], [0]>} : vector<2x8x8xbf16>, vector<2x8x16xbf16>, vector<2x8x16xf32> -> vector<2x8x16xf32>
    "tpu.trace_stop"() : () -> ()
    %63 = vector.shape_cast %62 : vector<2x8x16xf32> to vector<16x16xf32>
    %64 = vector.extract_strided_slice %35 {offsets = [0, 16], sizes = [16, 16], strides = [1, 1]} : vector<16x96xf32> to vector<16x16xf32>
    %65 = vector.shape_cast %64 : vector<16x16xf32> to vector<2x8x16xf32>
    %66 = vector.extract_strided_slice %35 {offsets = [0, 48], sizes = [16, 16], strides = [1, 1]} : vector<16x96xf32> to vector<16x16xf32>
    %67 = vector.shape_cast %66 : vector<16x16xf32> to vector<2x8x16xf32>
    %68 = vector.extract_strided_slice %35 {offsets = [0, 80], sizes = [16, 16], strides = [1, 1]} : vector<16x96xf32> to vector<16x16xf32>
    %69 = vector.shape_cast %68 : vector<16x16xf32> to vector<2x8x16xf32>
    %70 = arith.truncf %65 : vector<2x8x16xf32> to vector<2x8x16xbf16>
    %71 = arith.truncf %67 : vector<2x8x16xf32> to vector<2x8x16xbf16>
    "tpu.trace_start"() <{level = 10 : i32, message = "bqd,bkd->bqk"}> : () -> ()
    %cst_25 = arith.constant dense<0.000000e+00> : vector<2x8x8xf32>
    %72 = tpu.matmul %70, %71, %cst_25 {dimension_numbers = #tpu.dot_dimension_numbers<[2], [2], [1], [1], [0, 0, 0, 1, 1, 1], [0], [0]>} : vector<2x8x16xbf16>, vector<2x8x16xbf16>, vector<2x8x8xf32> -> vector<2x8x8xf32>
    "tpu.trace_stop"() : () -> ()
    %cst_26 = arith.constant 2.500000e-01 : f32
    %73 = vector.broadcast %cst_26 : f32 to vector<2x8x8xf32>
    %74 = arith.mulf %72, %73 : vector<2x8x8xf32>
    %75 = vector.shape_cast %27 : vector<2x8xf32> to vector<2x1x8xf32>
    %76 = vector.broadcast %75 : vector<2x1x8xf32> to vector<2x8x8xf32>
    %77 = arith.addf %74, %76 : vector<2x8x8xf32>
    %cst_27 = arith.constant dense<0xFF800000> : vector<2x8xf32>
    %78 = vector.multi_reduction <maximumf>, %77, %cst_27 [2] : vector<2x8x8xf32> to vector<2x8xf32>
    %79 = vector.shape_cast %78 : vector<2x8xf32> to vector<2x8x1xf32>
    %80 = vector.broadcast %79 : vector<2x8x1xf32> to vector<2x8x8xf32>
    %81 = arith.subf %77, %80 : vector<2x8x8xf32>
    %82 = math.exp %81 : vector<2x8x8xf32>
    %cst_28 = arith.constant dense<0.000000e+00> : vector<2x8xf32>
    %83 = vector.multi_reduction <add>, %82, %cst_28 [2] : vector<2x8x8xf32> to vector<2x8xf32>
    %84 = vector.shape_cast %83 : vector<2x8xf32> to vector<2x8x1xf32>
    %85 = tpu.reciprocal %84 {approx = true} : vector<2x8x1xf32> -> vector<2x8x1xf32>
    %86 = vector.broadcast %85 : vector<2x8x1xf32> to vector<2x8x8xf32>
    %87 = arith.mulf %82, %86 : vector<2x8x8xf32>
    %88 = arith.truncf %87 : vector<2x8x8xf32> to vector<2x8x8xbf16>
    %89 = arith.truncf %69 : vector<2x8x16xf32> to vector<2x8x16xbf16>
    "tpu.trace_start"() <{level = 10 : i32, message = "bqk,bkd->bqd"}> : () -> ()
    %cst_29 = arith.constant dense<0.000000e+00> : vector<2x8x16xf32>
    %90 = tpu.matmul %88, %89, %cst_29 {dimension_numbers = #tpu.dot_dimension_numbers<[2], [1], [1], [2], [0, 0, 0, 1, 1, 2], [0], [0]>} : vector<2x8x8xbf16>, vector<2x8x16xbf16>, vector<2x8x16xf32> -> vector<2x8x16xf32>
    "tpu.trace_stop"() : () -> ()
    %91 = vector.shape_cast %90 : vector<2x8x16xf32> to vector<16x16xf32>
    %92 = tpu.concatenate %63, %91 in 1 : vector<16x16xf32>, vector<16x16xf32> -> vector<16x32xf32>
    %c0_30 = arith.constant 0 : index
    %c0_31 = arith.constant 0 : index
    %c0_32 = arith.constant 0 : index
    %93 = vector.load %arg6[%c0_30, %c0_31, %c0_32] : memref<2x32x32xbf16, #tpu.memory_space<vmem>>, vector<1x32x32xbf16>
    %94 = vector.shape_cast %93 : vector<1x32x32xbf16> to vector<32x32xbf16>
    %c0_33 = arith.constant 0 : index
    %c0_34 = arith.constant 0 : index
    %c0_35 = arith.constant 0 : index
    %95 = vector.load %arg7[%c0_33, %c0_34, %c0_35] : memref<2x1x32xf32, #tpu.memory_space<vmem>>, vector<1x1x32xf32>
    %96 = vector.shape_cast %95 : vector<1x1x32xf32> to vector<1x32xf32>
    %97 = arith.truncf %92 : vector<16x32xf32> to vector<16x32xbf16>
    %cst_36 = arith.constant dense<0.000000e+00> : vector<16x32xf32>
    %98 = tpu.matmul %97, %94, %cst_36 {dimension_numbers = #tpu.dot_dimension_numbers<[1], [0], [0], [1], [0, 0, 1, 1], [], []>} : vector<16x32xbf16>, vector<32x32xbf16>, vector<16x32xf32> -> vector<16x32xf32>
    %99 = vector.broadcast %96 : vector<1x32xf32> to vector<16x32xf32>
    %100 = arith.addf %98, %99 : vector<16x32xf32>
    %101 = arith.addf %100, %22 : vector<16x32xf32>
    %c0_37 = arith.constant 0 : index
    %c0_38 = arith.constant 0 : index
    %c0_39 = arith.constant 0 : index
    %102 = vector.load %arg8[%c0_37, %c0_38, %c0_39] : memref<2x1x32xf32, #tpu.memory_space<vmem>>, vector<1x1x32xf32>
    %103 = vector.shape_cast %102 : vector<1x1x32xf32> to vector<1x32xf32>
    %c0_40 = arith.constant 0 : index
    %c0_41 = arith.constant 0 : index
    %c0_42 = arith.constant 0 : index
    %104 = vector.load %arg9[%c0_40, %c0_41, %c0_42] : memref<2x1x32xf32, #tpu.memory_space<vmem>>, vector<1x1x32xf32>
    %105 = vector.shape_cast %104 : vector<1x1x32xf32> to vector<1x32xf32>
    %cst_43 = arith.constant dense<0.000000e+00> : vector<16xf32>
    %106 = vector.multi_reduction <add>, %101, %cst_43 [1] : vector<16x32xf32> to vector<16xf32>
    %107 = vector.shape_cast %106 : vector<16xf32> to vector<16x1xf32>
    %cst_44 = arith.constant 3.200000e+01 : f32
    %108 = vector.broadcast %cst_44 : f32 to vector<16x1xf32>
    %109 = arith.divf %107, %108 : vector<16x1xf32>
    %110 = vector.broadcast %109 : vector<16x1xf32> to vector<16x32xf32>
    %111 = arith.subf %101, %110 : vector<16x32xf32>
    %112 = arith.mulf %111, %111 : vector<16x32xf32>
    %cst_45 = arith.constant dense<0.000000e+00> : vector<16xf32>
    %113 = vector.multi_reduction <add>, %112, %cst_45 [1] : vector<16x32xf32> to vector<16xf32>
    %114 = vector.shape_cast %113 : vector<16xf32> to vector<16x1xf32>
    %cst_46 = arith.constant 3.200000e+01 : f32
    %115 = vector.broadcast %cst_46 : f32 to vector<16x1xf32>
    %116 = arith.divf %114, %115 : vector<16x1xf32>
    %cst_47 = arith.constant 9.99999996E-13 : f32
    %117 = vector.broadcast %cst_47 : f32 to vector<16x1xf32>
    %118 = arith.addf %116, %117 : vector<16x1xf32>
    %119 = math.rsqrt %118 : vector<16x1xf32>
    %120 = vector.broadcast %119 : vector<16x1xf32> to vector<16x32xf32>
    %121 = arith.mulf %111, %120 : vector<16x32xf32>
    %122 = vector.broadcast %103 : vector<1x32xf32> to vector<16x32xf32>
    %123 = arith.mulf %121, %122 : vector<16x32xf32>
    %124 = vector.broadcast %105 : vector<1x32xf32> to vector<16x32xf32>
    %125 = arith.addf %123, %124 : vector<16x32xf32>
    %c0_48 = arith.constant 0 : index
    %c0_49 = arith.constant 0 : index
    %c0_50 = arith.constant 0 : index
    %126 = vector.load %arg10[%c0_48, %c0_49, %c0_50] : memref<2x32x64xbf16, #tpu.memory_space<vmem>>, vector<1x32x64xbf16>
    %127 = vector.shape_cast %126 : vector<1x32x64xbf16> to vector<32x64xbf16>
    %c0_51 = arith.constant 0 : index
    %c0_52 = arith.constant 0 : index
    %c0_53 = arith.constant 0 : index
    %128 = vector.load %arg11[%c0_51, %c0_52, %c0_53] : memref<2x1x64xf32, #tpu.memory_space<vmem>>, vector<1x1x64xf32>
    %129 = vector.shape_cast %128 : vector<1x1x64xf32> to vector<1x64xf32>
    %130 = arith.truncf %125 : vector<16x32xf32> to vector<16x32xbf16>
    %cst_54 = arith.constant dense<0.000000e+00> : vector<16x64xf32>
    %131 = tpu.matmul %130, %127, %cst_54 {dimension_numbers = #tpu.dot_dimension_numbers<[1], [0], [0], [1], [0, 0, 1, 1], [], []>} : vector<16x32xbf16>, vector<32x64xbf16>, vector<16x64xf32> -> vector<16x64xf32>
    %132 = vector.broadcast %129 : vector<1x64xf32> to vector<16x64xf32>
    %133 = arith.addf %131, %132 : vector<16x64xf32>
    %cst_55 = arith.constant 5.000000e-01 : f32
    %134 = vector.broadcast %cst_55 : f32 to vector<16x64xf32>
    %135 = arith.mulf %134, %133 : vector<16x64xf32>
    %cst_56 = arith.constant 4.471500e-02 : f32
    %136 = vector.broadcast %cst_56 : f32 to vector<16x64xf32>
    %137 = arith.mulf %136, %133 : vector<16x64xf32>
    %138 = arith.mulf %137, %133 : vector<16x64xf32>
    %139 = arith.mulf %138, %133 : vector<16x64xf32>
    %140 = arith.addf %133, %139 : vector<16x64xf32>
    %cst_57 = arith.constant 0.797884583 : f32
    %141 = vector.broadcast %cst_57 : f32 to vector<16x64xf32>
    %142 = arith.mulf %141, %140 : vector<16x64xf32>
    %143 = math.tanh %142 : vector<16x64xf32>
    %cst_58 = arith.constant 1.000000e+00 : f32
    %144 = vector.broadcast %cst_58 : f32 to vector<16x64xf32>
    %145 = arith.addf %144, %143 : vector<16x64xf32>
    %146 = arith.mulf %135, %145 : vector<16x64xf32>
    %c0_59 = arith.constant 0 : index
    %c0_60 = arith.constant 0 : index
    %c0_61 = arith.constant 0 : index
    %147 = vector.load %arg12[%c0_59, %c0_60, %c0_61] : memref<2x64x32xbf16, #tpu.memory_space<vmem>>, vector<1x64x32xbf16>
    %148 = vector.shape_cast %147 : vector<1x64x32xbf16> to vector<64x32xbf16>
    %c0_62 = arith.constant 0 : index
    %c0_63 = arith.constant 0 : index
    %c0_64 = arith.constant 0 : index
    %149 = vector.load %arg13[%c0_62, %c0_63, %c0_64] : memref<2x1x32xf32, #tpu.memory_space<vmem>>, vector<1x1x32xf32>
    %150 = vector.shape_cast %149 : vector<1x1x32xf32> to vector<1x32xf32>
    %151 = arith.truncf %146 : vector<16x64xf32> to vector<16x64xbf16>
    %cst_65 = arith.constant dense<0.000000e+00> : vector<16x32xf32>
    %152 = tpu.matmul %151, %148, %cst_65 {dimension_numbers = #tpu.dot_dimension_numbers<[1], [0], [0], [1], [0, 0, 1, 1], [], []>} : vector<16x64xbf16>, vector<64x32xbf16>, vector<16x32xf32> -> vector<16x32xf32>
    %153 = vector.broadcast %150 : vector<1x32xf32> to vector<16x32xf32>
    %154 = arith.addf %152, %153 : vector<16x32xf32>
    %155 = arith.addf %154, %125 : vector<16x32xf32>
    %c0_66 = arith.constant 0 : index
    %c0_67 = arith.constant 0 : index
    %c0_68 = arith.constant 0 : index
    %156 = vector.load %arg14[%c0_66, %c0_67, %c0_68] : memref<2x1x32xf32, #tpu.memory_space<vmem>>, vector<1x1x32xf32>
    %157 = vector.shape_cast %156 : vector<1x1x32xf32> to vector<1x32xf32>
    %c0_69 = arith.constant 0 : index
    %c0_70 = arith.constant 0 : index
    %c0_71 = arith.constant 0 : index
    %158 = vector.load %arg15[%c0_69, %c0_70, %c0_71] : memref<2x1x32xf32, #tpu.memory_space<vmem>>, vector<1x1x32xf32>
    %159 = vector.shape_cast %158 : vector<1x1x32xf32> to vector<1x32xf32>
    %cst_72 = arith.constant dense<0.000000e+00> : vector<16xf32>
    %160 = vector.multi_reduction <add>, %155, %cst_72 [1] : vector<16x32xf32> to vector<16xf32>
    %161 = vector.shape_cast %160 : vector<16xf32> to vector<16x1xf32>
    %cst_73 = arith.constant 3.200000e+01 : f32
    %162 = vector.broadcast %cst_73 : f32 to vector<16x1xf32>
    %163 = arith.divf %161, %162 : vector<16x1xf32>
    %164 = vector.broadcast %163 : vector<16x1xf32> to vector<16x32xf32>
    %165 = arith.subf %155, %164 : vector<16x32xf32>
    %166 = arith.mulf %165, %165 : vector<16x32xf32>
    %cst_74 = arith.constant dense<0.000000e+00> : vector<16xf32>
    %167 = vector.multi_reduction <add>, %166, %cst_74 [1] : vector<16x32xf32> to vector<16xf32>
    %168 = vector.shape_cast %167 : vector<16xf32> to vector<16x1xf32>
    %cst_75 = arith.constant 3.200000e+01 : f32
    %169 = vector.broadcast %cst_75 : f32 to vector<16x1xf32>
    %170 = arith.divf %168, %169 : vector<16x1xf32>
    %cst_76 = arith.constant 9.99999996E-13 : f32
    %171 = vector.broadcast %cst_76 : f32 to vector<16x1xf32>
    %172 = arith.addf %170, %171 : vector<16x1xf32>
    %173 = math.rsqrt %172 : vector<16x1xf32>
    %174 = vector.broadcast %173 : vector<16x1xf32> to vector<16x32xf32>
    %175 = arith.mulf %165, %174 : vector<16x32xf32>
    %176 = vector.broadcast %157 : vector<1x32xf32> to vector<16x32xf32>
    %177 = arith.mulf %175, %176 : vector<16x32xf32>
    %178 = vector.broadcast %159 : vector<1x32xf32> to vector<16x32xf32>
    %179 = arith.addf %177, %178 : vector<16x32xf32>
    %c1 = arith.constant 1 : index
    %c0_77 = arith.constant 0 : index
    %c0_78 = arith.constant 0 : index
    %180 = vector.load %arg4[%c1, %c0_77, %c0_78] : memref<2x32x96xbf16, #tpu.memory_space<vmem>>, vector<1x32x96xbf16>
    %181 = vector.shape_cast %180 : vector<1x32x96xbf16> to vector<32x96xbf16>
    %c1_79 = arith.constant 1 : index
    %c0_80 = arith.constant 0 : index
    %c0_81 = arith.constant 0 : index
    %182 = vector.load %arg5[%c1_79, %c0_80, %c0_81] : memref<2x1x96xf32, #tpu.memory_space<vmem>>, vector<1x1x96xf32>
    %183 = vector.shape_cast %182 : vector<1x1x96xf32> to vector<1x96xf32>
    %184 = arith.truncf %179 : vector<16x32xf32> to vector<16x32xbf16>
    %cst_82 = arith.constant dense<0.000000e+00> : vector<16x96xf32>
    %185 = tpu.matmul %184, %181, %cst_82 {dimension_numbers = #tpu.dot_dimension_numbers<[1], [0], [0], [1], [0, 0, 1, 1], [], []>} : vector<16x32xbf16>, vector<32x96xbf16>, vector<16x96xf32> -> vector<16x96xf32>
    %186 = vector.broadcast %183 : vector<1x96xf32> to vector<16x96xf32>
    %187 = arith.addf %185, %186 : vector<16x96xf32>
    %188 = vector.extract_strided_slice %187 {offsets = [0, 0], sizes = [16, 16], strides = [1, 1]} : vector<16x96xf32> to vector<16x16xf32>
    %189 = vector.shape_cast %188 : vector<16x16xf32> to vector<2x8x16xf32>
    %190 = vector.extract_strided_slice %187 {offsets = [0, 32], sizes = [16, 16], strides = [1, 1]} : vector<16x96xf32> to vector<16x16xf32>
    %191 = vector.shape_cast %190 : vector<16x16xf32> to vector<2x8x16xf32>
    %192 = vector.extract_strided_slice %187 {offsets = [0, 64], sizes = [16, 16], strides = [1, 1]} : vector<16x96xf32> to vector<16x16xf32>
    %193 = vector.shape_cast %192 : vector<16x16xf32> to vector<2x8x16xf32>
    %194 = arith.truncf %189 : vector<2x8x16xf32> to vector<2x8x16xbf16>
    %195 = arith.truncf %191 : vector<2x8x16xf32> to vector<2x8x16xbf16>
    "tpu.trace_start"() <{level = 10 : i32, message = "bqd,bkd->bqk"}> : () -> ()
    %cst_83 = arith.constant dense<0.000000e+00> : vector<2x8x8xf32>
    %196 = tpu.matmul %194, %195, %cst_83 {dimension_numbers = #tpu.dot_dimension_numbers<[2], [2], [1], [1], [0, 0, 0, 1, 1, 1], [0], [0]>} : vector<2x8x16xbf16>, vector<2x8x16xbf16>, vector<2x8x8xf32> -> vector<2x8x8xf32>
    "tpu.trace_stop"() : () -> ()
    %cst_84 = arith.constant 2.500000e-01 : f32
    %197 = vector.broadcast %cst_84 : f32 to vector<2x8x8xf32>
    %198 = arith.mulf %196, %197 : vector<2x8x8xf32>
    %199 = vector.shape_cast %27 : vector<2x8xf32> to vector<2x1x8xf32>
    %200 = vector.broadcast %199 : vector<2x1x8xf32> to vector<2x8x8xf32>
    %201 = arith.addf %198, %200 : vector<2x8x8xf32>
    %cst_85 = arith.constant dense<0xFF800000> : vector<2x8xf32>
    %202 = vector.multi_reduction <maximumf>, %201, %cst_85 [2] : vector<2x8x8xf32> to vector<2x8xf32>
    %203 = vector.shape_cast %202 : vector<2x8xf32> to vector<2x8x1xf32>
    %204 = vector.broadcast %203 : vector<2x8x1xf32> to vector<2x8x8xf32>
    %205 = arith.subf %201, %204 : vector<2x8x8xf32>
    %206 = math.exp %205 : vector<2x8x8xf32>
    %cst_86 = arith.constant dense<0.000000e+00> : vector<2x8xf32>
    %207 = vector.multi_reduction <add>, %206, %cst_86 [2] : vector<2x8x8xf32> to vector<2x8xf32>
    %208 = vector.shape_cast %207 : vector<2x8xf32> to vector<2x8x1xf32>
    %209 = tpu.reciprocal %208 {approx = true} : vector<2x8x1xf32> -> vector<2x8x1xf32>
    %210 = vector.broadcast %209 : vector<2x8x1xf32> to vector<2x8x8xf32>
    %211 = arith.mulf %206, %210 : vector<2x8x8xf32>
    %212 = arith.truncf %211 : vector<2x8x8xf32> to vector<2x8x8xbf16>
    %213 = arith.truncf %193 : vector<2x8x16xf32> to vector<2x8x16xbf16>
    "tpu.trace_start"() <{level = 10 : i32, message = "bqk,bkd->bqd"}> : () -> ()
    %cst_87 = arith.constant dense<0.000000e+00> : vector<2x8x16xf32>
    %214 = tpu.matmul %212, %213, %cst_87 {dimension_numbers = #tpu.dot_dimension_numbers<[2], [1], [1], [2], [0, 0, 0, 1, 1, 2], [0], [0]>} : vector<2x8x8xbf16>, vector<2x8x16xbf16>, vector<2x8x16xf32> -> vector<2x8x16xf32>
    "tpu.trace_stop"() : () -> ()
    %215 = vector.shape_cast %214 : vector<2x8x16xf32> to vector<16x16xf32>
    %216 = vector.extract_strided_slice %187 {offsets = [0, 16], sizes = [16, 16], strides = [1, 1]} : vector<16x96xf32> to vector<16x16xf32>
    %217 = vector.shape_cast %216 : vector<16x16xf32> to vector<2x8x16xf32>
    %218 = vector.extract_strided_slice %187 {offsets = [0, 48], sizes = [16, 16], strides = [1, 1]} : vector<16x96xf32> to vector<16x16xf32>
    %219 = vector.shape_cast %218 : vector<16x16xf32> to vector<2x8x16xf32>
    %220 = vector.extract_strided_slice %187 {offsets = [0, 80], sizes = [16, 16], strides = [1, 1]} : vector<16x96xf32> to vector<16x16xf32>
    %221 = vector.shape_cast %220 : vector<16x16xf32> to vector<2x8x16xf32>
    %222 = arith.truncf %217 : vector<2x8x16xf32> to vector<2x8x16xbf16>
    %223 = arith.truncf %219 : vector<2x8x16xf32> to vector<2x8x16xbf16>
    "tpu.trace_start"() <{level = 10 : i32, message = "bqd,bkd->bqk"}> : () -> ()
    %cst_88 = arith.constant dense<0.000000e+00> : vector<2x8x8xf32>
    %224 = tpu.matmul %222, %223, %cst_88 {dimension_numbers = #tpu.dot_dimension_numbers<[2], [2], [1], [1], [0, 0, 0, 1, 1, 1], [0], [0]>} : vector<2x8x16xbf16>, vector<2x8x16xbf16>, vector<2x8x8xf32> -> vector<2x8x8xf32>
    "tpu.trace_stop"() : () -> ()
    %cst_89 = arith.constant 2.500000e-01 : f32
    %225 = vector.broadcast %cst_89 : f32 to vector<2x8x8xf32>
    %226 = arith.mulf %224, %225 : vector<2x8x8xf32>
    %227 = vector.shape_cast %27 : vector<2x8xf32> to vector<2x1x8xf32>
    %228 = vector.broadcast %227 : vector<2x1x8xf32> to vector<2x8x8xf32>
    %229 = arith.addf %226, %228 : vector<2x8x8xf32>
    %cst_90 = arith.constant dense<0xFF800000> : vector<2x8xf32>
    %230 = vector.multi_reduction <maximumf>, %229, %cst_90 [2] : vector<2x8x8xf32> to vector<2x8xf32>
    %231 = vector.shape_cast %230 : vector<2x8xf32> to vector<2x8x1xf32>
    %232 = vector.broadcast %231 : vector<2x8x1xf32> to vector<2x8x8xf32>
    %233 = arith.subf %229, %232 : vector<2x8x8xf32>
    %234 = math.exp %233 : vector<2x8x8xf32>
    %cst_91 = arith.constant dense<0.000000e+00> : vector<2x8xf32>
    %235 = vector.multi_reduction <add>, %234, %cst_91 [2] : vector<2x8x8xf32> to vector<2x8xf32>
    %236 = vector.shape_cast %235 : vector<2x8xf32> to vector<2x8x1xf32>
    %237 = tpu.reciprocal %236 {approx = true} : vector<2x8x1xf32> -> vector<2x8x1xf32>
    %238 = vector.broadcast %237 : vector<2x8x1xf32> to vector<2x8x8xf32>
    %239 = arith.mulf %234, %238 : vector<2x8x8xf32>
    %240 = arith.truncf %239 : vector<2x8x8xf32> to vector<2x8x8xbf16>
    %241 = arith.truncf %221 : vector<2x8x16xf32> to vector<2x8x16xbf16>
    "tpu.trace_start"() <{level = 10 : i32, message = "bqk,bkd->bqd"}> : () -> ()
    %cst_92 = arith.constant dense<0.000000e+00> : vector<2x8x16xf32>
    %242 = tpu.matmul %240, %241, %cst_92 {dimension_numbers = #tpu.dot_dimension_numbers<[2], [1], [1], [2], [0, 0, 0, 1, 1, 2], [0], [0]>} : vector<2x8x8xbf16>, vector<2x8x16xbf16>, vector<2x8x16xf32> -> vector<2x8x16xf32>
    "tpu.trace_stop"() : () -> ()
    %243 = vector.shape_cast %242 : vector<2x8x16xf32> to vector<16x16xf32>
    %244 = tpu.concatenate %215, %243 in 1 : vector<16x16xf32>, vector<16x16xf32> -> vector<16x32xf32>
    %c1_93 = arith.constant 1 : index
    %c0_94 = arith.constant 0 : index
    %c0_95 = arith.constant 0 : index
    %245 = vector.load %arg6[%c1_93, %c0_94, %c0_95] : memref<2x32x32xbf16, #tpu.memory_space<vmem>>, vector<1x32x32xbf16>
    %246 = vector.shape_cast %245 : vector<1x32x32xbf16> to vector<32x32xbf16>
    %c1_96 = arith.constant 1 : index
    %c0_97 = arith.constant 0 : index
    %c0_98 = arith.constant 0 : index
    %247 = vector.load %arg7[%c1_96, %c0_97, %c0_98] : memref<2x1x32xf32, #tpu.memory_space<vmem>>, vector<1x1x32xf32>
    %248 = vector.shape_cast %247 : vector<1x1x32xf32> to vector<1x32xf32>
    %249 = arith.truncf %244 : vector<16x32xf32> to vector<16x32xbf16>
    %cst_99 = arith.constant dense<0.000000e+00> : vector<16x32xf32>
    %250 = tpu.matmul %249, %246, %cst_99 {dimension_numbers = #tpu.dot_dimension_numbers<[1], [0], [0], [1], [0, 0, 1, 1], [], []>} : vector<16x32xbf16>, vector<32x32xbf16>, vector<16x32xf32> -> vector<16x32xf32>
    %251 = vector.broadcast %248 : vector<1x32xf32> to vector<16x32xf32>
    %252 = arith.addf %250, %251 : vector<16x32xf32>
    %253 = arith.addf %252, %179 : vector<16x32xf32>
    %c1_100 = arith.constant 1 : index
    %c0_101 = arith.constant 0 : index
    %c0_102 = arith.constant 0 : index
    %254 = vector.load %arg8[%c1_100, %c0_101, %c0_102] : memref<2x1x32xf32, #tpu.memory_space<vmem>>, vector<1x1x32xf32>
    %255 = vector.shape_cast %254 : vector<1x1x32xf32> to vector<1x32xf32>
    %c1_103 = arith.constant 1 : index
    %c0_104 = arith.constant 0 : index
    %c0_105 = arith.constant 0 : index
    %256 = vector.load %arg9[%c1_103, %c0_104, %c0_105] : memref<2x1x32xf32, #tpu.memory_space<vmem>>, vector<1x1x32xf32>
    %257 = vector.shape_cast %256 : vector<1x1x32xf32> to vector<1x32xf32>
    %cst_106 = arith.constant dense<0.000000e+00> : vector<16xf32>
    %258 = vector.multi_reduction <add>, %253, %cst_106 [1] : vector<16x32xf32> to vector<16xf32>
    %259 = vector.shape_cast %258 : vector<16xf32> to vector<16x1xf32>
    %cst_107 = arith.constant 3.200000e+01 : f32
    %260 = vector.broadcast %cst_107 : f32 to vector<16x1xf32>
    %261 = arith.divf %259, %260 : vector<16x1xf32>
    %262 = vector.broadcast %261 : vector<16x1xf32> to vector<16x32xf32>
    %263 = arith.subf %253, %262 : vector<16x32xf32>
    %264 = arith.mulf %263, %263 : vector<16x32xf32>
    %cst_108 = arith.constant dense<0.000000e+00> : vector<16xf32>
    %265 = vector.multi_reduction <add>, %264, %cst_108 [1] : vector<16x32xf32> to vector<16xf32>
    %266 = vector.shape_cast %265 : vector<16xf32> to vector<16x1xf32>
    %cst_109 = arith.constant 3.200000e+01 : f32
    %267 = vector.broadcast %cst_109 : f32 to vector<16x1xf32>
    %268 = arith.divf %266, %267 : vector<16x1xf32>
    %cst_110 = arith.constant 9.99999996E-13 : f32
    %269 = vector.broadcast %cst_110 : f32 to vector<16x1xf32>
    %270 = arith.addf %268, %269 : vector<16x1xf32>
    %271 = math.rsqrt %270 : vector<16x1xf32>
    %272 = vector.broadcast %271 : vector<16x1xf32> to vector<16x32xf32>
    %273 = arith.mulf %263, %272 : vector<16x32xf32>
    %274 = vector.broadcast %255 : vector<1x32xf32> to vector<16x32xf32>
    %275 = arith.mulf %273, %274 : vector<16x32xf32>
    %276 = vector.broadcast %257 : vector<1x32xf32> to vector<16x32xf32>
    %277 = arith.addf %275, %276 : vector<16x32xf32>
    %c1_111 = arith.constant 1 : index
    %c0_112 = arith.constant 0 : index
    %c0_113 = arith.constant 0 : index
    %278 = vector.load %arg10[%c1_111, %c0_112, %c0_113] : memref<2x32x64xbf16, #tpu.memory_space<vmem>>, vector<1x32x64xbf16>
    %279 = vector.shape_cast %278 : vector<1x32x64xbf16> to vector<32x64xbf16>
    %c1_114 = arith.constant 1 : index
    %c0_115 = arith.constant 0 : index
    %c0_116 = arith.constant 0 : index
    %280 = vector.load %arg11[%c1_114, %c0_115, %c0_116] : memref<2x1x64xf32, #tpu.memory_space<vmem>>, vector<1x1x64xf32>
    %281 = vector.shape_cast %280 : vector<1x1x64xf32> to vector<1x64xf32>
    %282 = arith.truncf %277 : vector<16x32xf32> to vector<16x32xbf16>
    %cst_117 = arith.constant dense<0.000000e+00> : vector<16x64xf32>
    %283 = tpu.matmul %282, %279, %cst_117 {dimension_numbers = #tpu.dot_dimension_numbers<[1], [0], [0], [1], [0, 0, 1, 1], [], []>} : vector<16x32xbf16>, vector<32x64xbf16>, vector<16x64xf32> -> vector<16x64xf32>
    %284 = vector.broadcast %281 : vector<1x64xf32> to vector<16x64xf32>
    %285 = arith.addf %283, %284 : vector<16x64xf32>
    %cst_118 = arith.constant 5.000000e-01 : f32
    %286 = vector.broadcast %cst_118 : f32 to vector<16x64xf32>
    %287 = arith.mulf %286, %285 : vector<16x64xf32>
    %cst_119 = arith.constant 4.471500e-02 : f32
    %288 = vector.broadcast %cst_119 : f32 to vector<16x64xf32>
    %289 = arith.mulf %288, %285 : vector<16x64xf32>
    %290 = arith.mulf %289, %285 : vector<16x64xf32>
    %291 = arith.mulf %290, %285 : vector<16x64xf32>
    %292 = arith.addf %285, %291 : vector<16x64xf32>
    %cst_120 = arith.constant 0.797884583 : f32
    %293 = vector.broadcast %cst_120 : f32 to vector<16x64xf32>
    %294 = arith.mulf %293, %292 : vector<16x64xf32>
    %295 = math.tanh %294 : vector<16x64xf32>
    %cst_121 = arith.constant 1.000000e+00 : f32
    %296 = vector.broadcast %cst_121 : f32 to vector<16x64xf32>
    %297 = arith.addf %296, %295 : vector<16x64xf32>
    %298 = arith.mulf %287, %297 : vector<16x64xf32>
    %c1_122 = arith.constant 1 : index
    %c0_123 = arith.constant 0 : index
    %c0_124 = arith.constant 0 : index
    %299 = vector.load %arg12[%c1_122, %c0_123, %c0_124] : memref<2x64x32xbf16, #tpu.memory_space<vmem>>, vector<1x64x32xbf16>
    %300 = vector.shape_cast %299 : vector<1x64x32xbf16> to vector<64x32xbf16>
    %c1_125 = arith.constant 1 : index
    %c0_126 = arith.constant 0 : index
    %c0_127 = arith.constant 0 : index
    %301 = vector.load %arg13[%c1_125, %c0_126, %c0_127] : memref<2x1x32xf32, #tpu.memory_space<vmem>>, vector<1x1x32xf32>
    %302 = vector.shape_cast %301 : vector<1x1x32xf32> to vector<1x32xf32>
    %303 = arith.truncf %298 : vector<16x64xf32> to vector<16x64xbf16>
    %cst_128 = arith.constant dense<0.000000e+00> : vector<16x32xf32>
    %304 = tpu.matmul %303, %300, %cst_128 {dimension_numbers = #tpu.dot_dimension_numbers<[1], [0], [0], [1], [0, 0, 1, 1], [], []>} : vector<16x64xbf16>, vector<64x32xbf16>, vector<16x32xf32> -> vector<16x32xf32>
    %305 = vector.broadcast %302 : vector<1x32xf32> to vector<16x32xf32>
    %306 = arith.addf %304, %305 : vector<16x32xf32>
    %307 = arith.addf %306, %277 : vector<16x32xf32>
    %c1_129 = arith.constant 1 : index
    %c0_130 = arith.constant 0 : index
    %c0_131 = arith.constant 0 : index
    %308 = vector.load %arg14[%c1_129, %c0_130, %c0_131] : memref<2x1x32xf32, #tpu.memory_space<vmem>>, vector<1x1x32xf32>
    %309 = vector.shape_cast %308 : vector<1x1x32xf32> to vector<1x32xf32>
    %c1_132 = arith.constant 1 : index
    %c0_133 = arith.constant 0 : index
    %c0_134 = arith.constant 0 : index
    %310 = vector.load %arg15[%c1_132, %c0_133, %c0_134] : memref<2x1x32xf32, #tpu.memory_space<vmem>>, vector<1x1x32xf32>
    %311 = vector.shape_cast %310 : vector<1x1x32xf32> to vector<1x32xf32>
    %cst_135 = arith.constant dense<0.000000e+00> : vector<16xf32>
    %312 = vector.multi_reduction <add>, %307, %cst_135 [1] : vector<16x32xf32> to vector<16xf32>
    %313 = vector.shape_cast %312 : vector<16xf32> to vector<16x1xf32>
    %cst_136 = arith.constant 3.200000e+01 : f32
    %314 = vector.broadcast %cst_136 : f32 to vector<16x1xf32>
    %315 = arith.divf %313, %314 : vector<16x1xf32>
    %316 = vector.broadcast %315 : vector<16x1xf32> to vector<16x32xf32>
    %317 = arith.subf %307, %316 : vector<16x32xf32>
    %318 = arith.mulf %317, %317 : vector<16x32xf32>
    %cst_137 = arith.constant dense<0.000000e+00> : vector<16xf32>
    %319 = vector.multi_reduction <add>, %318, %cst_137 [1] : vector<16x32xf32> to vector<16xf32>
    %320 = vector.shape_cast %319 : vector<16xf32> to vector<16x1xf32>
    %cst_138 = arith.constant 3.200000e+01 : f32
    %321 = vector.broadcast %cst_138 : f32 to vector<16x1xf32>
    %322 = arith.divf %320, %321 : vector<16x1xf32>
    %cst_139 = arith.constant 9.99999996E-13 : f32
    %323 = vector.broadcast %cst_139 : f32 to vector<16x1xf32>
    %324 = arith.addf %322, %323 : vector<16x1xf32>
    %325 = math.rsqrt %324 : vector<16x1xf32>
    %326 = vector.broadcast %325 : vector<16x1xf32> to vector<16x32xf32>
    %327 = arith.mulf %317, %326 : vector<16x32xf32>
    %328 = vector.broadcast %309 : vector<1x32xf32> to vector<16x32xf32>
    %329 = arith.mulf %327, %328 : vector<16x32xf32>
    %330 = vector.broadcast %311 : vector<1x32xf32> to vector<16x32xf32>
    %331 = arith.addf %329, %330 : vector<16x32xf32>
    %332 = vector.shape_cast %331 : vector<16x32xf32> to vector<2x8x32xf32>
    %333 = vector.extract_strided_slice %332 {offsets = [0, 0, 0], sizes = [2, 1, 32], strides = [1, 1, 1]} : vector<2x8x32xf32> to vector<2x1x32xf32>
    %334 = vector.shape_cast %333 : vector<2x1x32xf32> to vector<2x32xf32>
    %c0_140 = arith.constant 0 : index
    %c0_141 = arith.constant 0 : index
    %335 = vector.load %arg18[%c0_140, %c0_141] : memref<32x32xbf16, #tpu.memory_space<vmem>>, vector<32x32xbf16>
    %c0_142 = arith.constant 0 : index
    %c0_143 = arith.constant 0 : index
    %336 = vector.load %arg19[%c0_142, %c0_143] : memref<1x32xf32, #tpu.memory_space<vmem>>, vector<1x32xf32>
    %337 = arith.truncf %334 : vector<2x32xf32> to vector<2x32xbf16>
    %cst_144 = arith.constant dense<0.000000e+00> : vector<2x32xf32>
    %338 = tpu.matmul %337, %335, %cst_144 {dimension_numbers = #tpu.dot_dimension_numbers<[1], [0], [0], [1], [0, 0, 1, 1], [], []>} : vector<2x32xbf16>, vector<32x32xbf16>, vector<2x32xf32> -> vector<2x32xf32>
    %339 = vector.broadcast %336 : vector<1x32xf32> to vector<2x32xf32>
    %340 = arith.addf %338, %339 : vector<2x32xf32>
    %341 = math.tanh %340 : vector<2x32xf32>
    %c0_145 = arith.constant 0 : index
    %c0_146 = arith.constant 0 : index
    %342 = vector.load %arg20[%c0_145, %c0_146] : memref<32x16xbf16, #tpu.memory_space<vmem>>, vector<32x16xbf16>
    %c0_147 = arith.constant 0 : index
    %c0_148 = arith.constant 0 : index
    %343 = vector.load %arg21[%c0_147, %c0_148] : memref<1x16xf32, #tpu.memory_space<vmem>>, vector<1x16xf32>
    %344 = arith.truncf %341 : vector<2x32xf32> to vector<2x32xbf16>
    %cst_149 = arith.constant dense<0.000000e+00> : vector<2x16xf32>
    %345 = tpu.matmul %344, %342, %cst_149 {dimension_numbers = #tpu.dot_dimension_numbers<[1], [0], [0], [1], [0, 0, 1, 1], [], []>} : vector<2x32xbf16>, vector<32x16xbf16>, vector<2x16xf32> -> vector<2x16xf32>
    %346 = vector.broadcast %343 : vector<1x16xf32> to vector<2x16xf32>
    %347 = arith.addf %345, %346 : vector<2x16xf32>
    %cst_150 = arith.constant 0.000000e+00 : f32
    %348 = vector.broadcast %cst_150 : f32 to vector<2x16xf32>
    %349 = arith.maximumf %347, %348 : vector<2x16xf32>
    %c0_151 = arith.constant 0 : index
    %c0_152 = arith.constant 0 : index
    %350 = vector.load %arg22[%c0_151, %c0_152] : memref<16x8xbf16, #tpu.memory_space<vmem>>, vector<16x8xbf16>
    %c0_153 = arith.constant 0 : index
    %c0_154 = arith.constant 0 : index
    %351 = vector.load %arg23[%c0_153, %c0_154] : memref<1x8xf32, #tpu.memory_space<vmem>>, vector<1x8xf32>
    %352 = arith.truncf %349 : vector<2x16xf32> to vector<2x16xbf16>
    %cst_155 = arith.constant dense<0.000000e+00> : vector<2x8xf32>
    %353 = tpu.matmul %352, %350, %cst_155 {dimension_numbers = #tpu.dot_dimension_numbers<[1], [0], [0], [1], [0, 0, 1, 1], [], []>} : vector<2x16xbf16>, vector<16x8xbf16>, vector<2x8xf32> -> vector<2x8xf32>
    %354 = vector.broadcast %351 : vector<1x8xf32> to vector<2x8xf32>
    %355 = arith.addf %353, %354 : vector<2x8xf32>
    %cst_156 = arith.constant 0.000000e+00 : f32
    %356 = vector.broadcast %cst_156 : f32 to vector<2x8xf32>
    %357 = arith.maximumf %355, %356 : vector<2x8xf32>
    %c0_157 = arith.constant 0 : index
    %c0_158 = arith.constant 0 : index
    %358 = vector.load %arg24[%c0_157, %c0_158] : memref<8x2xbf16, #tpu.memory_space<vmem>>, vector<8x2xbf16>
    %c0_159 = arith.constant 0 : index
    %c0_160 = arith.constant 0 : index
    %359 = vector.load %arg25[%c0_159, %c0_160] : memref<1x2xf32, #tpu.memory_space<vmem>>, vector<1x2xf32>
    %360 = arith.truncf %357 : vector<2x8xf32> to vector<2x8xbf16>
    %cst_161 = arith.constant dense<0.000000e+00> : vector<2x2xf32>
    %361 = tpu.matmul %360, %358, %cst_161 {dimension_numbers = #tpu.dot_dimension_numbers<[1], [0], [0], [1], [0, 0, 1, 1], [], []>} : vector<2x8xbf16>, vector<8x2xbf16>, vector<2x2xf32> -> vector<2x2xf32>
    %362 = vector.broadcast %359 : vector<1x2xf32> to vector<2x2xf32>
    %363 = arith.addf %361, %362 : vector<2x2xf32>
    %c0_162 = arith.constant 0 : index
    %c0_163 = arith.constant 0 : index
    %364 = vector.load %arg26[%c0_162, %c0_163] : memref<2x2xf32, #tpu.memory_space<vmem>>, vector<2x2xf32>
    tpu.vector_store %arg26[%c0_162, %c0_163], %363 {strides = array<i32>} : memref<2x2xf32, #tpu.memory_space<vmem>>, vector<2x2xf32>,
    %cst_164 = arith.constant dense<0xFF800000> : vector<2xf32>
    %365 = vector.multi_reduction <maximumf>, %363, %cst_164 [1] : vector<2x2xf32> to vector<2xf32>
    %366 = vector.shape_cast %365 : vector<2xf32> to vector<2x1xf32>
    %367 = vector.broadcast %366 : vector<2x1xf32> to vector<2x2xf32>
    %368 = arith.subf %363, %367 : vector<2x2xf32>
    %369 = math.exp %368 : vector<2x2xf32>
    %cst_165 = arith.constant dense<0.000000e+00> : vector<2xf32>
    %370 = vector.multi_reduction <add>, %369, %cst_165 [1] : vector<2x2xf32> to vector<2xf32>
    %371 = vector.shape_cast %370 : vector<2xf32> to vector<2x1xf32>
    %372 = math.log %371 : vector<2x1xf32>
    %c0_166 = arith.constant 0 : index
    %c0_167 = arith.constant 0 : index
    %373 = vector.load %arg3[%c0_166, %c0_167] : memref<2x2xf32, #tpu.memory_space<vmem>>, vector<2x2xf32>
    %374 = vector.broadcast %372 : vector<2x1xf32> to vector<2x2xf32>
    %375 = arith.subf %368, %374 : vector<2x2xf32>
    %376 = arith.mulf %373, %375 : vector<2x2xf32>
    %cst_168 = arith.constant dense<0.000000e+00> : vector<2xf32>
    %377 = vector.multi_reduction <add>, %376, %cst_168 [1] : vector<2x2xf32> to vector<2xf32>
    %378 = vector.shape_cast %377 : vector<2xf32> to vector<2x1xf32>
    %cst_169 = arith.constant 0.000000e+00 : f32
    %379 = vector.broadcast %cst_169 : f32 to vector<2x1xf32>
    %380 = arith.subf %379, %378 : vector<2x1xf32>
    %cst_170 = arith.constant dense<0.000000e+00> : vector<1xf32>
    %381 = vector.multi_reduction <add>, %380, %cst_170 [0] : vector<2x1xf32> to vector<1xf32>
    %382 = vector.shape_cast %381 : vector<1xf32> to vector<1x1xf32>
    %cst_171 = arith.constant 5.000000e-01 : f32
    %383 = vector.broadcast %cst_171 : f32 to vector<1x1xf32>
    %384 = arith.mulf %382, %383 : vector<1x1xf32>
    %c0_172 = arith.constant 0 : index
    %c0_173 = arith.constant 0 : index
    %385 = vector.load %arg27[%c0_172, %c0_173] : memref<1x1xf32, #tpu.memory_space<vmem>>, vector<1x1xf32>
    tpu.vector_store %arg27[%c0_172, %c0_173], %384 {strides = array<i32>} : memref<1x1xf32, #tpu.memory_space<vmem>>, vector<1x1xf32>,
    return
  }
  func.func @transform_0(%arg0: i32) -> (i32, i32) {
    %c0_i32 = arith.constant 0 : i32
    %c0_i32_0 = arith.constant 0 : i32
    %c0_i32_1 = arith.constant 0 : i32
    return %c0_i32, %c0_i32_0 : i32, i32
  }
  func.func @transform_1(%arg0: i32) -> (i32, i32) {
    %c0_i32 = arith.constant 0 : i32
    %c0_i32_0 = arith.constant 0 : i32
    %c0_i32_1 = arith.constant 0 : i32
    return %c0_i32, %c0_i32_0 : i32, i32
  }
  func.func @transform_2(%arg0: i32) -> (i32, i32) {
    %c0_i32 = arith.constant 0 : i32
    %c0_i32_0 = arith.constant 0 : i32
    %c0_i32_1 = arith.constant 0 : i32
    return %c0_i32, %c0_i32_0 : i32, i32
  }
  func.func @transform_3(%arg0: i32) -> (i32, i32, i32) {
    %c0_i32 = arith.constant 0 : i32
    %c0_i32_0 = arith.constant 0 : i32
    %c0_i32_1 = arith.constant 0 : i32
    %c0_i32_2 = arith.constant 0 : i32
    return %c0_i32, %c0_i32_0, %c0_i32_1 : i32, i32, i32
  }
  func.func @transform_4(%arg0: i32) -> (i32, i32, i32) {
    %c0_i32 = arith.constant 0 : i32
    %c0_i32_0 = arith.constant 0 : i32
    %c0_i32_1 = arith.constant 0 : i32
    %c0_i32_2 = arith.constant 0 : i32
    return %c0_i32, %c0_i32_0, %c0_i32_1 : i32, i32, i32
  }
  func.func @transform_5(%arg0: i32) -> (i32, i32, i32) {
    %c0_i32 = arith.constant 0 : i32
    %c0_i32_0 = arith.constant 0 : i32
    %c0_i32_1 = arith.constant 0 : i32
    %c0_i32_2 = arith.constant 0 : i32
    return %c0_i32, %c0_i32_0, %c0_i32_1 : i32, i32, i32
  }
  func.func @transform_6(%arg0: i32) -> (i32, i32, i32) {
    %c0_i32 = arith.constant 0 : i32
    %c0_i32_0 = arith.constant 0 : i32
    %c0_i32_1 = arith.constant 0 : i32
    %c0_i32_2 = arith.constant 0 : i32
    return %c0_i32, %c0_i32_0, %c0_i32_1 : i32, i32, i32
  }
  func.func @transform_7(%arg0: i32) -> (i32, i32, i32) {
    %c0_i32 = arith.constant 0 : i32
    %c0_i32_0 = arith.constant 0 : i32
    %c0_i32_1 = arith.constant 0 : i32
    %c0_i32_2 = arith.constant 0 : i32
    return %c0_i32, %c0_i32_0, %c0_i32_1 : i32, i32, i32
  }
  func.func @transform_8(%arg0: i32) -> (i32, i32, i32) {
    %c0_i32 = arith.constant 0 : i32
    %c0_i32_0 = arith.constant 0 : i32
    %c0_i32_1 = arith.constant 0 : i32
    %c0_i32_2 = arith.constant 0 : i32
    return %c0_i32, %c0_i32_0, %c0_i32_1 : i32, i32, i32
  }
  func.func @transform_9(%arg0: i32) -> (i32, i32, i32) {
    %c0_i32 = arith.constant 0 : i32
    %c0_i32_0 = arith.constant 0 : i32
    %c0_i32_1 = arith.constant 0 : i32
    %c0_i32_2 = arith.constant 0 : i32
    return %c0_i32, %c0_i32_0, %c0_i32_1 : i32, i32, i32
  }
  func.func @transform_10(%arg0: i32) -> (i32, i32, i32) {
    %c0_i32 = arith.constant 0 : i32
    %c0_i32_0 = arith.constant 0 : i32
    %c0_i32_1 = arith.constant 0 : i32
    %c0_i32_2 = arith.constant 0 : i32
    return %c0_i32, %c0_i32_0, %c0_i32_1 : i32, i32, i32
  }
  func.func @transform_11(%arg0: i32) -> (i32, i32, i32) {
    %c0_i32 = arith.constant 0 : i32
    %c0_i32_0 = arith.constant 0 : i32
    %c0_i32_1 = arith.constant 0 : i32
    %c0_i32_2 = arith.constant 0 : i32
    return %c0_i32, %c0_i32_0, %c0_i32_1 : i32, i32, i32
  }
  func.func @transform_12(%arg0: i32) -> (i32, i32, i32) {
    %c0_i32 = arith.constant 0 : i32
    %c0_i32_0 = arith.constant 0 : i32
    %c0_i32_1 = arith.constant 0 : i32
    %c0_i32_2 = arith.constant 0 : i32
    return %c0_i32, %c0_i32_0, %c0_i32_1 : i32, i32, i32
  }
  func.func @transform_13(%arg0: i32) -> (i32, i32, i32) {
    %c0_i32 = arith.constant 0 : i32
    %c0_i32_0 = arith.constant 0 : i32
    %c0_i32_1 = arith.constant 0 : i32
    %c0_i32_2 = arith.constant 0 : i32
    return %c0_i32, %c0_i32_0, %c0_i32_1 : i32, i32, i32
  }
  func.func @transform_14(%arg0: i32) -> (i32, i32, i32) {
    %c0_i32 = arith.constant 0 : i32
    %c0_i32_0 = arith.constant 0 : i32
    %c0_i32_1 = arith.constant 0 : i32
    %c0_i32_2 = arith.constant 0 : i32
    return %c0_i32, %c0_i32_0, %c0_i32_1 : i32, i32, i32
  }
  func.func @transform_15(%arg0: i32) -> (i32, i32) {
    %c0_i32 = arith.constant 0 : i32
    %c0_i32_0 = arith.constant 0 : i32
    %c0_i32_1 = arith.constant 0 : i32
    return %c0_i32, %c0_i32_0 : i32, i32
  }
  func.func @transform_16(%arg0: i32) -> (i32, i32) {
    %c0_i32 = arith.constant 0 : i32
    %c0_i32_0 = arith.constant 0 : i32
    %c0_i32_1 = arith.constant 0 : i32
    return %c0_i32, %c0_i32_0 : i32, i32
  }
  func.func @transform_17(%arg0: i32) -> (i32, i32) {
    %c0_i32 = arith.constant 0 : i32
    %c0_i32_0 = arith.constant 0 : i32
    %c0_i32_1 = arith.constant 0 : i32
    return %c0_i32, %c0_i32_0 : i32, i32
  }
  func.func @transform_18(%arg0: i32) -> (i32, i32) {
    %c0_i32 = arith.constant 0 : i32
    %c0_i32_0 = arith.constant 0 : i32
    %c0_i32_1 = arith.constant 0 : i32
    return %c0_i32, %c0_i32_0 : i32, i32
  }
  func.func @transform_19(%arg0: i32) -> (i32, i32) {
    %c0_i32 = arith.constant 0 : i32
    %c0_i32_0 = arith.constant 0 : i32
    %c0_i32_1 = arith.constant 0 : i32
    return %c0_i32, %c0_i32_0 : i32, i32
  }
  func.func @transform_20(%arg0: i32) -> (i32, i32) {
    %c0_i32 = arith.constant 0 : i32
    %c0_i32_0 = arith.constant 0 : i32
    %c0_i32_1 = arith.constant 0 : i32
    return %c0_i32, %c0_i32_0 : i32, i32
  }
  func.func @transform_21(%arg0: i32) -> (i32, i32) {
    %c0_i32 = arith.constant 0 : i32
    %c0_i32_0 = arith.constant 0 : i32
    %c0_i32_1 = arith.constant 0 : i32
    return %c0_i32, %c0_i32_0 : i32, i32
  }
  func.func @transform_22(%arg0: i32) -> (i32, i32) {
    %c0_i32 = arith.constant 0 : i32
    %c0_i32_0 = arith.constant 0 : i32
    %c0_i32_1 = arith.constant 0 : i32
    return %c0_i32, %c0_i32_0 : i32, i32
  }
  func.func @transform_23(%arg0: i32) -> (i32, i32) {
    %c0_i32 = arith.constant 0 : i32
    %c0_i32_0 = arith.constant 0 : i32
    %c0_i32_1 = arith.constant 0 : i32
    return %c0_i32, %c0_i32_0 : i32, i32
  }
  func.func @transform_24(%arg0: i32) -> (i32, i32) {
    %c0_i32 = arith.constant 0 : i32
    %c0_i32_0 = arith.constant 0 : i32
    %c0_i32_1 = arith.constant 0 : i32
    return %c0_i32, %c0_i32_0 : i32, i32
  }
  func.func @transform_25(%arg0: i32) -> (i32, i32) {
    %c0_i32 = arith.constant 0 : i32
    %c0_i32_0 = arith.constant 0 : i32
    %c0_i32_1 = arith.constant 0 : i32
    return %c0_i32, %c0_i32_0 : i32, i32
  }
  func.func @transform_26(%arg0: i32) -> (i32, i32) {
    %c0_i32 = arith.constant 0 : i32
    %c0_i32_0 = arith.constant 0 : i32
    %c0_i32_1 = arith.constant 0 : i32
    return %c0_i32, %c0_i32_0 : i32, i32
  }
}

</mosaic_0001>

<bundles_post_ra>
// kernel: tpu_custom_call.1
= control target key start
LH: loop header
LB: loop body
LE: loop exit
PB: predicated region body
PF: predicated region fallthrough
CT: control target
= control target key end

     0   :  { %s3639_s0 = inlined_call_operand.vmem [shape: f32[16,32], index: 0, kind: input, shape index: {}]   ;;  %s3640_s1 = inlined_call_operand.vmem [shape: f32[2,8], index: 1, kind: input, shape index: {}]   ;;  %s3641_s2 = inlined_call_operand.hbm [shape: f32[2,2], index: 2, kind: input, shape index: {}]   ;;  %s3642_s3 = inlined_call_operand.vmem [shape: bf16[2,32,96], index: 3, kind: input, shape index: {}]   ;;  %s3643_s4 = inlined_call_operand.hbm [shape: f32[2,1,96], index: 4, kind: input, shape index: {}]   ;;  %s3644_s5 = inlined_call_operand.vmem [shape: bf16[2,32,32], index: 5, kind: input, shape index: {}]   ;;  %s3645_s6 = inlined_call_operand.hbm [shape: f32[2,1,32], index: 6, kind: input, shape index: {}]   ;;  %s3646_s7 = inlined_call_operand.hbm [shape: f32[2,1,32], index: 7, kind: input, shape index: {}]   ;;  %s3647_s8 = inlined_call_operand.hbm [shape: f32[2,1,32], index: 8, kind: input, shape index: {}]   ;;  %s3648_s9 = inlined_call_operand.vmem [shape: bf16[2,32,64], index: 9, kind: input, shape index: {}]   ;;  %s3649_s10 = inlined_call_operand.hbm [shape: f32[2,1,64], index: 10, kind: input, shape index: {}]   ;;  %s3650_s11 = inlined_call_operand.vmem [shape: bf16[2,64,32], index: 11, kind: input, shape index: {}]   ;;  %s3651_s12 = inlined_call_operand.vmem [shape: f32[2,1,32], index: 12, kind: input, shape index: {}]   ;;  %s3652_s13 = inlined_call_operand.vmem [shape: f32[2,1,32], index: 13, kind: input, shape index: {}]   ;;  %s3653_s14 = inlined_call_operand.vmem [shape: f32[2,1,32], index: 14, kind: input, shape index: {}]   ;;  %s3654_s15 = inlined_call_operand.vmem [shape: f32[1,32], index: 15, kind: input, shape index: {}]   ;;  %s3655_s16 = inlined_call_operand.vmem [shape: f32[1,32], index: 16, kind: input, shape index: {}]   ;;  %s3656_s17 = inlined_call_operand.vmem [shape: bf16[32,32], index: 17, kind: input, shape index: {}]   ;;  %s3657_s18 = inlined_call_operand.vmem [shape: f32[1,32], index: 18, kind: input, shape index: {}]   ;;  %s3658_s19 = inlined_call_operand.vmem [shape: bf16[32,16], index: 19, kind: input, shape index: {}]   ;;  %s3659_s20 = inlined_call_operand.vmem [shape: f32[1,16], index: 20, kind: input, shape index: {}]   ;;  %s3660_s21 = inlined_call_operand.vmem [shape: bf16[16,8], index: 21, kind: input, shape index: {}]   ;;  %s3661_s22 = inlined_call_operand.vmem [shape: f32[1,8], index: 22, kind: input, shape index: {}]   ;;  %s3662_s23 = inlined_call_operand.vmem [shape: bf16[8,2], index: 23, kind: input, shape index: {}]   ;;  %s3663_s24 = inlined_call_operand.vmem [shape: f32[1,2], index: 24, kind: input, shape index: {}]   ;;  %s3664_s25 = inlined_call_operand.hbm [shape: f32[2,2], index: 25, kind: output, shape index: {0}]   ;;  %s3665_s26 = inlined_call_operand.hbm [shape: f32[1,1], index: 26, kind: output, shape index: {1}]  }
   0x1   :  { %3678 = sst [smem:[#allocation22_spill]] %s3639_s0 }
   0x2   :  { %3679 = sst [smem:[#allocation23_spill]] %s3640_s1 }
   0x3   :  { %3680 = sst [smem:[#allocation24_spill]] %s3641_s2 }
   0x4   :  { %3681 = sst [smem:[#allocation25_spill]] %s3642_s3 }
   0x5   :  { %3682 = sst [smem:[#allocation26_spill]] %s3643_s4 }
   0x6   :  { %3683 = sst [smem:[#allocation27_spill]] %s3644_s5 }
   0x7   :  { %3684 = sst [smem:[#allocation28_spill]] %s3645_s6 }
   0x8   :  { %3685 = sst [smem:[#allocation29_spill]] %s3646_s7 }
   0x9   :  { %3686 = sst [smem:[#allocation30_spill]] %s3647_s8 }
   0xa   :  { %3687 = sst [smem:[#allocation31_spill]] %s3648_s9 }
   0xb   :  { %3688 = sst [smem:[#allocation32_spill]] %s3649_s10 }
   0xc   :  { %3689 = sst [smem:[#allocation33_spill]] %s3663_s24 }
   0xd   :  { %3690 = sst [smem:[#allocation34_spill]] %s3664_s25 }
   0xe   :  { %3691 = sst [smem:[#allocation35_spill]] %s3665_s26 }
   0xf   :  { %32 = vsyncpa [#allocation3], 0 }
  0x10   :  { %33 = vsyncpa [#allocation6], 0 }
  0x11   :  { %34 = vsyncpa [#allocation9], 0 }
  0x12   :  { %35 = vsyncpa [#allocation12], 0 }
  0x13   :  { %36 = vsyncpa [#allocation4], 0 }
  0x14   :  { %37 = vsyncpa [#allocation15], 0  ;;  %s2971_s27 = smov [#allocation5]   ;;  %s3692_s8 = sld [smem:[#allocation26_spill]] }
  0x15   :  { %s59_s3 = sshll.u32 %s2971_s27, 4  ;;  %s60_s3 = int_to_ptr.vmem [resolvable:$true] %s59_s3 }
  0x1a   :  { %s2783_s4 = scalar_lea.hbm %s3692_s8, 32 }
  0x1b   :  { %p2784_p0 = scmp.ne.s32.totalorder %s3692_s8, %s2783_s4  ;;  %p2787_p1 = scmp.lt.u32.totalorder %s2783_s4, %s3692_s8 }
  0x1d   :  { %p2789_p2 = pnand %p2787_p1, %p2784_p0 }
  0x1f   :  { %2792 = shalt.err (!%p2789_p2)
}
  0x20   :  { %s2793_s2 = scalar_lea.vmem %s60_s3, 32  ;;  %p2798_p4 = scmp.lt.s32.totalorder %s60_s3, %s60_s3 }
  0x21   :  { %p2794_p3 = scmp.ne.s32.totalorder %s60_s3, %s2793_s2  ;;  %p2799_p5 = scmp.lt.s32.totalorder %s2793_s2, %s2793_s2 }
  0x23   :  { %p2800_p6 = por %p2799_p5, %p2798_p4 }
  0x25   :  { %p2801_p7 = pnand %p2800_p6, %p2794_p3 }
  0x27   :  { %2804 = shalt.err (!%p2801_p7)
}
  0x28   :  { %s2972_s5 = smov 16   ;;  %s2973_s10 = smov 1  }
  0x29   :  { %65 = dma.hbm_to_vmem [thread:$0]  %s3692_s8, 32, %s60_s3, [#allocation6], %s2972_s5, %s2972_s5, %s2973_s10  }
  0x2a   :  { %s2974_s27 = smov [#allocation8]   ;;  %s2975_s28 = smov [#allocation2]  }
  0x2b   :  { %s85_s7 = sshll.u32 %s2974_s27, 4  ;;  %s48_s4 = sshll.u32 %s2975_s28, 4  ;;  %s86_s7 = int_to_ptr.vmem [resolvable:$true] %s85_s7  ;;  %s49_s4 = int_to_ptr.vmem [resolvable:$true] %s48_s4 }
  0x2c   :  { %s3693_s9 = sld [smem:[#allocation29_spill]] }
  0x32   :  { %s2805_s30 = scalar_lea.hbm %s3693_s9, 32 }
  0x33   :  { %p2806_p8 = scmp.ne.s32.totalorder %s3693_s9, %s2805_s30  ;;  %p2809_p9 = scmp.lt.u32.totalorder %s2805_s30, %s3693_s9 }
  0x35   :  { %p2811_p10 = pnand %p2809_p9, %p2806_p8 }
  0x37   :  { %2814 = shalt.err (!%p2811_p10)
}
  0x38   :  { %s2815_s3 = scalar_lea.vmem %s86_s7, 32  ;;  %p2820_p12 = scmp.lt.s32.totalorder %s86_s7, %s86_s7 }
  0x39   :  { %p2816_p11 = scmp.ne.s32.totalorder %s86_s7, %s2815_s3  ;;  %p2821_p13 = scmp.lt.s32.totalorder %s2815_s3, %s2815_s3 }
  0x3b   :  { %p2822_p0 = por %p2821_p13, %p2820_p12 }
  0x3d   :  { %p2823_p1 = pnand %p2822_p0, %p2816_p11 }
  0x3f   :  { %2826 = shalt.err (!%p2823_p1)
}
  0x40   :  { %91 = dma.hbm_to_vmem [thread:$0]  %s3693_s9, 32, %s86_s7, [#allocation9], %s2972_s5, %s2972_s5, %s2973_s10  }
  0x41   :  { %s3694_s25 = sld [smem:[#allocation24_spill]] }
  0x47   :  { %s2827_s1 = scalar_lea.hbm %s3694_s25, 32 }
  0x48   :  { %p2828_p2 = scmp.ne.s32.totalorder %s3694_s25, %s2827_s1  ;;  %p2831_p3 = scmp.lt.u32.totalorder %s2827_s1, %s3694_s25 }
  0x4a   :  { %p2833_p4 = pnand %p2831_p3, %p2828_p2 }
  0x4c   :  { %2836 = shalt.err (!%p2833_p4)
}
  0x4d   :  { %s2837_s30 = scalar_lea.vmem %s49_s4, 32  ;;  %p2842_p6 = scmp.lt.s32.totalorder %s49_s4, %s49_s4 }
  0x4e   :  { %p2838_p5 = scmp.ne.s32.totalorder %s49_s4, %s2837_s30  ;;  %p2843_p7 = scmp.lt.s32.totalorder %s2837_s30, %s2837_s30 }
  0x50   :  { %p2844_p8 = por %p2843_p7, %p2842_p6 }
  0x52   :  { %p2845_p9 = pnand %p2844_p8, %p2838_p5 }
  0x54   :  { %2848 = shalt.err (!%p2845_p9)
}
  0x55   :  { %51 = dma.hbm_to_vmem [thread:$0]  %s3694_s25, 32, %s49_s4, [#allocation3]  }
  0x56   :  { %s2976_s2 = smov [#allocation7]   ;;  %s2977_s8 = smov [#allocation10]  }
  0x57   :  { %s73_s3 = sshll.u32 %s2976_s2, 4  ;;  %s97_s6 = sshll.u32 %s2977_s8, 4  ;;  %s74_s3 = int_to_ptr.vmem [resolvable:$true] %s73_s3  ;;  %s98_s6 = int_to_ptr.vmem [resolvable:$true] %s97_s6 }
  0x58   :  { %s3695_s1 = sld [smem:[#allocation28_spill]] }
  0x5e   :  { %s2849_s27 = scalar_lea.hbm %s3695_s1, 32 }
  0x5f   :  { %p2850_p10 = scmp.ne.s32.totalorder %s3695_s1, %s2849_s27  ;;  %p2853_p11 = scmp.lt.u32.totalorder %s2849_s27, %s3695_s1 }
  0x61   :  { %p2855_p12 = pnand %p2853_p11, %p2850_p10 }
  0x63   :  { %2858 = shalt.err (!%p2855_p12)
}
  0x64   :  { %s2859_s4 = scalar_lea.vmem %s74_s3, 32  ;;  %p2864_p0 = scmp.lt.s32.totalorder %s74_s3, %s74_s3 }
  0x65   :  { %p2860_p13 = scmp.ne.s32.totalorder %s74_s3, %s2859_s4  ;;  %p2865_p1 = scmp.lt.s32.totalorder %s2859_s4, %s2859_s4 }
  0x67   :  { %p2866_p2 = por %p2865_p1, %p2864_p0 }
  0x69   :  { %p2867_p3 = pnand %p2866_p2, %p2860_p13 }
  0x6b   :  { %2870 = shalt.err (!%p2867_p3)
}
  0x6c   :  { %79 = dma.hbm_to_vmem [thread:$0]  %s3695_s1, 32, %s74_s3, [#allocation6], %s2972_s5, %s2972_s5, %s2973_s10  }
  0x6d   :  { %s3696_s8 = sld [smem:[#allocation30_spill]] }
  0x73   :  { %s2871_s26 = scalar_lea.hbm %s3696_s8, 32 }
  0x74   :  { %p2872_p4 = scmp.ne.s32.totalorder %s3696_s8, %s2871_s26  ;;  %p2875_p5 = scmp.lt.u32.totalorder %s2871_s26, %s3696_s8 }
  0x76   :  { %p2877_p6 = pnand %p2875_p5, %p2872_p4 }
  0x78   :  { %2880 = shalt.err (!%p2877_p6)
}
  0x79   :  { %s2881_s0 = scalar_lea.vmem %s98_s6, 32  ;;  %p2886_p8 = scmp.lt.s32.totalorder %s98_s6, %s98_s6 }
  0x7a   :  { %p2882_p7 = scmp.ne.s32.totalorder %s98_s6, %s2881_s0  ;;  %p2887_p9 = scmp.lt.s32.totalorder %s2881_s0, %s2881_s0 }
  0x7c   :  { %p2888_p10 = por %p2887_p9, %p2886_p8 }
  0x7e   :  { %p2889_p11 = pnand %p2888_p10, %p2882_p7 }
  0x80   :  { %2892 = shalt.err (!%p2889_p11)
}
  0x81   :  { %103 = dma.hbm_to_vmem [thread:$0]  %s3696_s8, 32, %s98_s6, [#allocation9], %s2972_s5, %s2972_s5, %s2973_s10  }
  0x82   :  { %s2978_s30 = smov [#allocation11]   ;;  %s3697_s9 = sld [smem:[#allocation32_spill]] }
  0x83   :  { %s111_s4 = sshll.u32 %s2978_s30, 4  ;;  %s112_s4 = int_to_ptr.vmem [resolvable:$true] %s111_s4 }
  0x88   :  { %s2893_s2 = scalar_lea.hbm %s3697_s9, 32 }
  0x89   :  { %p2894_p12 = scmp.ne.s32.totalorder %s3697_s9, %s2893_s2  ;;  %p2897_p13 = scmp.lt.u32.totalorder %s2893_s2, %s3697_s9 }
  0x8b   :  { %p2899_p0 = pnand %p2897_p13, %p2894_p12 }
  0x8d   :  { %2902 = shalt.err (!%p2899_p0)
}
  0x8e   :  { %s2903_s29 = scalar_lea.vmem %s112_s4, 32  ;;  %p2908_p2 = scmp.lt.s32.totalorder %s112_s4, %s112_s4 }
  0x8f   :  { %p2904_p1 = scmp.ne.s32.totalorder %s112_s4, %s2903_s29  ;;  %p2909_p3 = scmp.lt.s32.totalorder %s2903_s29, %s2903_s29 }
  0x91   :  { %p2910_p4 = por %p2909_p3, %p2908_p2 }
  0x93   :  { %p2911_p5 = pnand %p2910_p4, %p2904_p1 }
  0x95   :  { %2914 = shalt.err (!%p2911_p5)
}
  0x96   :  { %117 = dma.hbm_to_vmem [thread:$0]  %s3697_s9, 32, %s112_s4, [#allocation12], %s2972_s5, %s2972_s5, %s2973_s10  }
  0x97   :  { %2959 = dma.done.wait [#allocation3], 32  }
  0x98   :  { %2960 = vsyncadd [#allocation3], 4294967264 }
  0x99   :  { %2961 = dma.done.wait [#allocation6], 64  }
  0x9a   :  { %2962 = vsyncadd [#allocation6], 4294967232 }
  0x9b   :  { %2963 = dma.done.wait [#allocation9], 64  }
  0x9c   :  { %2964 = vsyncadd [#allocation9], 4294967232 }
  0x9d   :  { %2965 = dma.done.wait [#allocation12], 32  }
  0x9e   :  { %2966 = vsyncadd [#allocation12], 4294967264  ;;  %vm169_vm0 = vcmask 261120   ;;  %s3698_s1 = sld [smem:[#allocation22_spill]]  ;;  %s3699_s7 = sld [smem:[#allocation25_spill]]  ;;  %v2979_v15 = vmov 0.0   ;;  %v391_v49 = vlaneseq }
  0x9f   :  { %2468 = vmatprep.subr.bf16.mxu0 %v2979_v15  ;;  %2476 = vmatprep.subr.bf16.mxu1 %v2979_v15  ;;  %vm2980_vm1 = vmmov 0   ;;  %v2300_v25 = vld [vmem:[%s3654_s15] ss:$0 sm:$0xff]  ;;  %v2302_v34 = vld [vmem:[#allocation5] ss:$0 sm:$0xff]  ;;  %s2981_s15 = smov 96  }
  0xa0   :  { %2472 = vmatprep.mubr.msk.bf16.mxu0 %vm2980_vm1, %v2979_v15  ;;  %2478 = vmatprep.mubr.msk.bf16.mxu1 %vm2980_vm1, %v2979_v15  ;;  %v2301_v29 = vld [vmem:[%s3655_s16] ss:$0 sm:$0xff]  ;;  %vm289_vm2 = vcmask 130048   ;;  %v2982_v47 = vmov 1966171168   ;;  %s3700_s6 = sld [smem:[#allocation23_spill]] }
  0xa1   :  { %v389_v48 = vunpack.c.l.s4 %v2982_v47  ;;  %v392_v53 = vshrl.u32 %v391_v49, 7  ;;  %vm422_vm3 = vcmask 64512   ;;  %s2983_s8 = smov 64   ;;  %s2984_s0 = smov 80   ;;  %vm452_vm4 = vcmask 1043456  }
  0xa2   :  { %s2985_s3 = smov 112   ;;  %s3701_s10 = sld [smem:[#allocation27_spill]]  ;;  %vm1018_vm5 = vcmask 523264   ;;  %vm1995_vm6 = vcmask 1041409   ;;  %vm2237_vm7 = vcmask 9216  }
  0xa3   :  { %v390_v52 = vunpack.c.0.s8 %v389_v48  ;;  %v412_v59 = vsub.s32 0, %v392_v53  ;;  %s3702_s24 = sld [smem:[#allocation31_spill]]  ;;  %s3703_s16 = sld [smem:[#allocation33_spill]] }
  0xa4   :  { %v165_v0 = vld [vmem:[%s3698_s1] sm:$0xff]  ;;  %v166_v1 = vld [vmem:[%s3698_s1 + $0x8] sm:$0xff]  ;;  %s2986_s1 = smov 48  }
  0xa5   :  { %v170_v2 = vsel %vm169_vm0, %v165_v0, 0.0  ;;  %v173_v3 = vsel %vm169_vm0, %v166_v1, 0.0  ;;  %v2692_v14 = vld [vmem:[%s3699_s7] sm:$0xff]   ;;  %v2693_v16 = vld [vmem:[%s3699_s7 + $0x8] sm:$0xff]   ;;  %v393_v55 = vsub.s32 %v390_v52, %v392_v53 }
  0xa6   :  { %171 = vadd.xlane.f32.xlu0 %v170_v2  ;;  %2469 = vmatpush3.bf16.msra.mxu0 %v2692_v14  ;;  %v213_v50 = vld [vmem:[%s3700_s6] sm:$0x3] }
  0xa7   :  { %2470 = vmatprep.subr.bf16.mxu0 %v2979_v15  ;;  %v214_v51 = vsub.f32 1.0, %v213_v50 }
  0xa9   :  { %v215_v54 = vmul.f32 -1e+09, %v214_v51 }
  0xaa   :  { %174 = vadd.xlane.f32.xlu0 %v173_v3  ;;  %2471 = vmatpush3.bf16.msra.mxu0 %v2693_v16 }
  0xab   :  { %2482 = vmatprep.subr.bf16.mxu0 %v2979_v15  ;;  %v394_v56 = vrot.slane %v215_v54, %v393_v55 }
  0xad   :  { %v395_v57 = vcombine.high %v394_v56, %v394_v56  ;;  %v402_v58 = vrot.slane %v394_v56, %v393_v55 }
  0xaf   :  { %v409_v60 = vrot.slane %v395_v57, %v393_v55  ;;  %v3273_v61 = vrot.slane %v402_v58, %v412_v59 }
 0x133   :  { %v172_v4 = vpop.xlane.xlu0 %171 }
 0x134   :  { %v177_v5 = vmul.f32 0.03125, %v172_v4 }
 0x136   :  { %v179_v6 = vsub.f32 %v165_v0, %v177_v5 }
 0x137   :  { %v175_v7 = vpop.xlane.xlu0 %174 }
 0x138   :  { %v178_v8 = vmul.f32 0.03125, %v175_v7  ;;  %v181_v9 = vmul.f32 %v179_v6, %v179_v6 }
 0x13a   :  { %v180_v10 = vsub.f32 %v166_v1, %v178_v8  ;;  %v183_v11 = vsel %vm169_vm0, %v181_v9, 0.0  ;;  %v3275_v1 = vrot.slane %v409_v60, %v412_v59 }
 0x13b   :  { %184 = vadd.xlane.f32.xlu1 %v183_v11 }
 0x13c   :  { %v182_v12 = vmul.f32 %v180_v10, %v180_v10 }
 0x13e   :  { %v186_v13 = vsel %vm169_vm0, %v182_v12, 0.0 }
 0x13f   :  { %187 = vadd.xlane.f32.xlu1 %v186_v13 }
 0x1c8   :  { %v185_v17 = vpop.xlane.xlu1 %184 }
 0x1c9   :  { %v189_v18 = vmul.f32 0.03125, %v185_v17 }
 0x1cb   :  { %v191_v19 = vadd.f32 1e-12, %v189_v18 }
 0x1cc   :  { %v188_v20 = vpop.xlane.xlu1 %187 }
 0x1cd   :  { %2717 = vrsqrt.f32 %v191_v19  ;;  %v190_v21 = vmul.f32 0.03125, %v188_v20 }
 0x1cf   :  { %v192_v22 = vadd.f32 1e-12, %v190_v21 }
 0x1d1   :  { %2719 = vrsqrt.f32 %v192_v22 }
 0x1d7   :  { %v2718_v23 = vpop.eup %2717 }
 0x1d8   :  { %v195_v24 = vmul.f32 %v2718_v23, %v179_v6 }
 0x1da   :  { %v203_v28 = vmul.f32 %v2300_v25, %v195_v24 }
 0x1db   :  { %v2720_v26 = vpop.eup %2719 }
 0x1dc   :  { %v196_v27 = vmul.f32 %v2720_v26, %v180_v10  ;;  %v3241_v31 = vadd.f32 %v2301_v29, %v203_v28 }
 0x1de   :  { %v204_v30 = vmul.f32 %v2300_v25, %v196_v27 }
 0x1e0   :  { %v3243_v32 = vadd.f32 %v2301_v29, %v204_v30 }
 0x1e2   :  { %v221_v33 = vpack.c.bf16 %v3243_v32, %v3241_v31 }
 0x1e4   :  { %2473 = vmatmul.mubr.msk.bf16.vlgmr.msra.gmra.mrb[0].mxu0 %vm169_vm0, %v221_v33 }
 0x1e5   :  { %2484 = vmatprep.mubr.msk.bf16.mxu0 %vm2980_vm1, %v2979_v15 }
 0x2b7   :  { %v277_v35 = vpop.f32.mrb[0].mxu0 }
 0x2b8   :  { %v278_v36 = vadd.f32 %v2302_v34, %v277_v35  ;;  %v2474_v37 = vpop.f32.mrb[1].mxu0 }
 0x2b9   :  { %v280_v38 = vpop.f32.mrb[2].mxu0 }
 0x2ba   :  { %v3250_v39 = vpack.c.bf16 %v278_v36, %v278_v36  ;;  %v281_v40 = vadd.f32 %v2302_v34, %v280_v38  ;;  %v2475_v41 = vpop.f32.mrb[3].mxu0 }
 0x2bc   :  { %v3252_v42 = vpack.c.bf16 %v281_v40, %v281_v40  ;;  %287 = vrot.lane.b32.xlu0 %v3250_v39, %s2981_s15 }
 0x2be   :  { %337 = vrot.lane.b32.xlu1 %v3252_v42, %s2981_s15 }
 0x32e   :  { %v288_v43 = vpop.permute.xlu0 %287 }
 0x32f   :  { %v294_v44 = vsel %vm289_vm2, %v288_v43, 0 }
 0x330   :  { %2477 = vmatpush3.bf16.xpose.msra.mxu1 %v294_v44  ;;  %v338_v45 = vpop.permute.xlu1 %337 }
 0x331   :  { %v343_v46 = vsel %vm289_vm2, %v338_v45, 0  ;;  %2488 = vmatprep.subr.bf16.mxu1 %v2979_v15 }
 0x332   :  { %2483 = vmatpush3.bf16.xpose.msra.mxu0 %v343_v46 }
 0x333   :  { %2494 = vmatprep.subr.bf16.mxu0 %v2979_v15 }
 0x337   :  { %2479 = vmatmul.mubr.msk.bf16.vlgmr.msra.gmra.mrb[0].mxu1 %vm289_vm2, %v3250_v39 }
 0x338   :  { %2490 = vmatprep.mubr.msk.bf16.mxu1 %vm2980_vm1, %v2979_v15 }
 0x339   :  { %2485 = vmatmul.mubr.msk.bf16.vlgmr.msra.gmra.mrb[4].mxu0 %vm289_vm2, %v3252_v42 }
 0x33a   :  { %2496 = vmatprep.mubr.msk.bf16.mxu0 %vm2980_vm1, %v2979_v15 }
 0x40a   :  { %v330_v62 = vpop.f32.mrb[0].mxu1 }
 0x40b   :  { %v385_v63 = vmul.f32 0.25, %v330_v62  ;;  %v2480_v0 = vpop.f32.mrb[1].mxu1 }
 0x40c   :  { %v333_v2 = vpop.f32.mrb[2].mxu1  ;;  %v379_v3 = vpop.f32.mrb[4].mxu0 }
 0x40d   :  { %v386_v4 = vmul.f32 0.25, %v379_v3  ;;  %v2481_v5 = vpop.f32.mrb[3].mxu1  ;;  %v2486_v6 = vpop.f32.mrb[5].mxu0  ;;  %v420_v7 = vadd.f32 %v3273_v61, %v385_v63 }
 0x40e   :  { %v382_v8 = vpop.f32.mrb[6].mxu0 }
 0x40f   :  { %v2487_v9 = vpop.f32.mrb[7].mxu0  ;;  %v423_v10 = vsel %vm422_vm3, %v420_v7, -inf  ;;  %v421_v11 = vadd.f32 %v3275_v1, %v386_v4 }
 0x410   :  { %424 = vmax.xlane.f32.xlu1 %v423_v10 }
 0x411   :  { %v426_v12 = vsel %vm422_vm3, %v421_v11, -inf }
 0x412   :  { %427 = vmax.xlane.f32.xlu0 %v426_v12 }
 0x421   :  { %496 = vrot.lane.b32.xlu1 %v3252_v42, %s2983_s8 }
 0x425   :  { %546 = vrot.lane.b32.xlu1 %v3250_v39, %s2984_s0 }
 0x49d   :  { %v425_v13 = vpop.xlane.xlu1 %424 }
 0x49e   :  { %v429_v14 = vsub.f32 %v420_v7, %v425_v13 }
 0x49f   :  { %v428_v16 = vpop.xlane.xlu0 %427 }
 0x4a0   :  { %v431_v17 = vmul.f32 1.442695, %v429_v14  ;;  %v430_v18 = vsub.f32 %v421_v11, %v428_v16 }
 0x4a1   :  { %v497_v19 = vpop.permute.xlu1 %496 }
 0x4a2   :  { %2721 = vpow2.f32 %v431_v17  ;;  %v433_v20 = vmul.f32 1.442695, %v430_v18  ;;  %v502_v21 = vsel %vm452_vm4, %v497_v19, 0 }
 0x4a3   :  { %2495 = vmatpush3.bf16.msra.mxu0 %v502_v21 }
 0x4a4   :  { %2723 = vpow2.f32 %v433_v20  ;;  %2506 = vmatprep.subr.bf16.mxu0 %v2979_v15 }
 0x4a5   :  { %v547_v26 = vpop.permute.xlu1 %546 }
 0x4a6   :  { %v552_v40 = vsel %vm289_vm2, %v547_v26, 0 }
 0x4ac   :  { %v2722_v22 = vpop.eup %2721 }
 0x4ad   :  { %v435_v23 = vsel %vm422_vm3, %v2722_v22, 0.0 }
 0x4ae   :  { %v2724_v24 = vpop.eup %2723  ;;  %436 = vadd.xlane.f32.xlu0 %v435_v23 }
 0x4af   :  { %v438_v25 = vsel %vm422_vm3, %v2724_v24, 0.0 }
 0x4b0   :  { %439 = vadd.xlane.f32.xlu1 %v438_v25 }
 0x4c1   :  { %596 = vrot.lane.b32.xlu1 %v3252_v42, %s2984_s0 }
 0x4c4   :  { %447 = vrot.lane.b32.xlu0 %v3250_v39, %s2983_s8 }
 0x4c5   :  { %594 = vrot.lane.b32.xlu1 %v3252_v42, %s2985_s3 }
 0x4c8   :  { %544 = vrot.lane.b32.xlu0 %v3250_v39, %s2985_s3 }
 0x53b   :  { %v437_v27 = vpop.xlane.xlu0 %436 }
 0x53c   :  { %2725 = vrcp.f32 %v437_v27  ;;  %v2694_v27 = vld [vmem:[%s3701_s10] sm:$0xff]  }
 0x53d   :  { %v440_v28 = vpop.xlane.xlu1 %439 }
 0x53e   :  { %2727 = vrcp.f32 %v440_v28  ;;  %v2695_v28 = vld [vmem:[%s3701_s10 + $0x8] sm:$0xff]  }
 0x53f   :  { %v448_v29 = vpop.permute.xlu0 %447 }
 0x540   :  { %v454_v30 = vsel %vm452_vm4, %v448_v29, 0 }
 0x541   :  { %2489 = vmatpush3.bf16.msra.mxu1 %v454_v30  ;;  %v597_v38 = vpop.permute.xlu1 %596 }
 0x542   :  { %2500 = vmatprep.subr.bf16.mxu1 %v2979_v15  ;;  %v602_v43 = vsel %vm289_vm2, %v597_v38, 0 }
 0x543   :  { %v545_v44 = vpop.permute.xlu0 %544 }
 0x545   :  { %v595_v45 = vpop.permute.xlu1 %594 }
 0x546   :  { %v2726_v33 = vpop.eup %2725 }
 0x547   :  { %v443_v34 = vmul.f32 %v2726_v33, %v2722_v22 }
 0x548   :  { %v2728_v35 = vpop.eup %2727 }
 0x549   :  { %v444_v36 = vmul.f32 %v2728_v35, %v2724_v24  ;;  %v445_v37 = vpack.c.bf16 %v443_v34, %v443_v34 }
 0x54b   :  { %2491 = vmatmul.mubr.msk.bf16.vlgmr.msra.gmra.mrb[4].mxu1 %vm422_vm3, %v445_v37  ;;  %v446_v41 = vpack.c.bf16 %v444_v36, %v444_v36 }
 0x54c   :  { %2501 = vmatpush3.bf16.xpose.msra.mxu1 %v552_v40  ;;  %2502 = vmatprep.mubr.msk.bf16.mxu1 %vm2980_vm1, %v2979_v15 }
 0x54d   :  { %2497 = vmatmul.mubr.msk.bf16.vlgmr.msra.gmra.mrb[8].mxu0 %vm422_vm3, %v446_v41  ;;  %2512 = vmatprep.subr.bf16.mxu1 %v2979_v15 }
 0x54e   :  { %2507 = vmatpush3.bf16.xpose.msra.mxu0 %v602_v43  ;;  %2508 = vmatprep.mubr.msk.bf16.mxu0 %vm2980_vm1, %v2979_v15 }
 0x54f   :  { %2518 = vmatprep.subr.bf16.mxu0 %v2979_v15 }
 0x553   :  { %2503 = vmatmul.mubr.msk.bf16.vlgmr.msra.gmra.mrb[8].mxu1 %vm289_vm2, %v545_v44 }
 0x554   :  { %2514 = vmatprep.mubr.msk.bf16.mxu1 %vm2980_vm1, %v2979_v15 }
 0x555   :  { %2509 = vmatmul.mubr.msk.bf16.vlgmr.msra.gmra.mrb[12].mxu0 %vm289_vm2, %v595_v45 }
 0x556   :  { %2520 = vmatprep.mubr.msk.bf16.mxu0 %vm2980_vm1, %v2979_v15 }
 0x61e   :  { %v3315_v46 = vpop.f32.mrb[4].mxu1 }
 0x61f   :  { %v2492_v47 = vpop.f32.mrb[5].mxu1 }
 0x620   :  { %v493_v48 = vpop.f32.mrb[6].mxu1  ;;  %v3317_v49 = vpop.f32.mrb[8].mxu0 }
 0x621   :  { %v2493_v50 = vpop.f32.mrb[7].mxu1  ;;  %v2498_v51 = vpop.f32.mrb[9].mxu0 }
 0x622   :  { %v541_v52 = vpop.f32.mrb[10].mxu0  ;;  %v2314_v50 = vld [vmem:[#allocation7] ss:$0 sm:$0xff] }
 0x623   :  { %v2499_v53 = vpop.f32.mrb[11].mxu0 }
 0x626   :  { %v588_v54 = vpop.f32.mrb[8].mxu1 }
 0x627   :  { %v644_v55 = vmul.f32 0.25, %v588_v54  ;;  %v2504_v56 = vpop.f32.mrb[9].mxu1 }
 0x628   :  { %v591_v57 = vpop.f32.mrb[10].mxu1  ;;  %v638_v58 = vpop.f32.mrb[12].mxu0 }
 0x629   :  { %v645_v59 = vmul.f32 0.25, %v638_v58  ;;  %v2505_v60 = vpop.f32.mrb[11].mxu1  ;;  %v2510_v62 = vpop.f32.mrb[13].mxu0  ;;  %v646_v63 = vadd.f32 %v644_v55, %v3273_v61 }
 0x62a   :  { %v641_v0 = vpop.f32.mrb[14].mxu0 }
 0x62b   :  { %v2511_v2 = vpop.f32.mrb[15].mxu0  ;;  %v648_v3 = vsel %vm422_vm3, %v646_v63, -inf  ;;  %v647_v4 = vadd.f32 %v645_v59, %v3275_v1 }
 0x62c   :  { %649 = vmax.xlane.f32.xlu0 %v648_v3 }
 0x62d   :  { %v651_v5 = vsel %vm422_vm3, %v647_v4, -inf }
 0x62e   :  { %652 = vmax.xlane.f32.xlu1 %v651_v5 }
 0x63f   :  { %720 = vrot.lane.b32.xlu1 %v3252_v42, %s2986_s1 }
 0x6b9   :  { %v650_v6 = vpop.xlane.xlu0 %649 }
 0x6ba   :  { %v654_v7 = vsub.f32 %v646_v63, %v650_v6  ;;  %v2697_v6 = vld [vmem:[%s3702_s24 + $0x8] sm:$0xff]  }
 0x6bb   :  { %v653_v8 = vpop.xlane.xlu1 %652 }
 0x6bc   :  { %v656_v9 = vmul.f32 1.442695, %v654_v7  ;;  %v655_v10 = vsub.f32 %v647_v4, %v653_v8 }
 0x6be   :  { %2729 = vpow2.f32 %v656_v9  ;;  %v658_v11 = vmul.f32 1.442695, %v655_v10 }
 0x6bf   :  { %v721_v12 = vpop.permute.xlu1 %720 }
 0x6c0   :  { %2731 = vpow2.f32 %v658_v11  ;;  %v726_v13 = vsel %vm452_vm4, %v721_v12, 0 }
 0x6c1   :  { %2519 = vmatpush3.bf16.msra.mxu0 %v726_v13 }
 0x6c2   :  { %2532 = vmatprep.subr.bf16.mxu0 %v2979_v15 }
 0x6c8   :  { %v2730_v14 = vpop.eup %2729 }
 0x6c9   :  { %v660_v16 = vsel %vm422_vm3, %v2730_v14, 0.0 }
 0x6ca   :  { %v2732_v17 = vpop.eup %2731  ;;  %661 = vadd.xlane.f32.xlu0 %v660_v16  ;;  %v2318_v16 = vld [vmem:[#allocation8] ss:$0 sm:$0xff] }
 0x6cb   :  { %v663_v42 = vsel %vm422_vm3, %v2732_v17, 0.0 }
 0x6ce   :  { %664 = vadd.xlane.f32.xlu0 %v663_v42 }
 0x6e4   :  { %672 = vrot.lane.b32.xlu0 %v3250_v39, %s2986_s1 }
 0x757   :  { %v662_v18 = vpop.xlane.xlu0 %661 }
 0x758   :  { %2733 = vrcp.f32 %v662_v18 }
 0x75b   :  { %v665_v19 = vpop.xlane.xlu0 %664 }
 0x75c   :  { %2735 = vrcp.f32 %v665_v19  ;;  %v2319_v19 = vld [vmem:[#allocation10] ss:$0 sm:$0xff] }
 0x75f   :  { %v673_v20 = vpop.permute.xlu0 %672 }
 0x760   :  { %v678_v21 = vsel %vm452_vm4, %v673_v20, 0 }
 0x761   :  { %2513 = vmatpush3.bf16.msra.mxu1 %v678_v21 }
 0x762   :  { %v2734_v22 = vpop.eup %2733  ;;  %2524 = vmatprep.subr.bf16.mxu1 %v2979_v15 }
 0x763   :  { %v668_v23 = vmul.f32 %v2734_v22, %v2730_v14 }
 0x765   :  { %v670_v24 = vpack.c.bf16 %v668_v23, %v668_v23 }
 0x766   :  { %v2736_v25 = vpop.eup %2735 }
 0x767   :  { %v669_v26 = vmul.f32 %v2736_v25, %v2732_v17  ;;  %2515 = vmatmul.mubr.msk.bf16.vlgmr.msra.gmra.mrb[12].mxu1 %vm422_vm3, %v670_v24  ;;  %v2698_v24 = vld [vmem:[%s3650_s11] sm:$0xff]   ;;  %v2699_v25 = vld [vmem:[%s3650_s11 + $0x8] sm:$0xff]  }
 0x768   :  { %2528 = vmatprep.mubr.msk.bf16.mxu1 %vm2980_vm1, %v2979_v15  ;;  %2525 = vmatpush3.bf16.msra.mxu1 %v2694_v27  ;;  %v2320_v27 = vld [vmem:[#allocation11] ss:$0 sm:$0xff] }
 0x769   :  { %v671_v39 = vpack.c.bf16 %v669_v26, %v669_v26  ;;  %2526 = vmatprep.subr.bf16.mxu1 %v2979_v15  ;;  %v2700_v26 = vld [vmem:[%s3650_s11 + $0x10] sm:$0xff]  }
 0x76b   :  { %2521 = vmatmul.mubr.msk.bf16.vlgmr.msra.gmra.mrb[16].mxu0 %vm422_vm3, %v671_v39  ;;  %v2701_v39 = vld [vmem:[%s3650_s11 + $0x18] sm:$0xff]  }
 0x76c   :  { %2536 = vmatprep.mubr.msk.bf16.mxu0 %vm2980_vm1, %v2979_v15  ;;  %2527 = vmatpush3.bf16.msra.mxu1 %v2695_v28 }
 0x76d   :  { %2540 = vmatprep.subr.bf16.mxu1 %v2979_v15 }
 0x83a   :  { %v714_v29 = vpop.f32.mrb[12].mxu1 }
 0x83b   :  { %v2516_v30 = vpop.f32.mrb[13].mxu1 }
 0x83c   :  { %v717_v33 = vpop.f32.mrb[14].mxu1 }
 0x83d   :  { %v2517_v34 = vpop.f32.mrb[15].mxu1 }
 0x83e   :  { %v762_v35 = vpop.f32.mrb[16].mxu0 }
 0x83f   :  { %v2682_v36 = vpack.i.bf16 %v762_v35, %v714_v29  ;;  %v2522_v37 = vpop.f32.mrb[17].mxu0 }
 0x840   :  { %v765_v38 = vpop.f32.mrb[18].mxu0 }
 0x841   :  { %2683 = vrot.lane.b32.xlu1 %v2682_v36, %s2972_s5  ;;  %v2523_v40 = vpop.f32.mrb[19].mxu0 }
 0x8b3   :  { %v2684_v41 = vpop.permute.xlu1 %2683 }
 0x8b4   :  { %v2686_v43 = vunpack.i.h.bf16 %v2684_v41  ;;  %v2685_v44 = vunpack.i.l.bf16 %v2684_v41 }
 0x8b6   :  { %v777_v45 = vsel %vm289_vm2, %v3317_v49, %v2686_v43  ;;  %v776_v47 = vsel %vm289_vm2, %v3315_v46, %v2685_v44 }
 0x8b7   :  { %v783_v48 = vpack.c.bf16 %v777_v45, %v776_v47 }
 0x8b9   :  { %2529 = vmatmul.mubr.msk.bf16.vlgmr.msra.gmra.mrb[16].mxu1 %vm169_vm0, %v783_v48 }
 0x8ba   :  { %2548 = vmatprep.mubr.msk.bf16.mxu1 %vm2980_vm1, %v2979_v15  ;;  %2541 = vmatpush3.bf16.msra.mxu1 %v2698_v24 }
 0x8bb   :  { %2542 = vmatprep.subr.bf16.mxu1 %v2979_v15 }
 0x8be   :  { %2543 = vmatpush3.bf16.msra.mxu1 %v2699_v25 }
 0x8bf   :  { %2544 = vmatprep.subr.bf16.mxu1 %v2979_v15 }
 0x8c2   :  { %2545 = vmatpush3.bf16.msra.mxu1 %v2700_v26 }
 0x8c3   :  { %2546 = vmatprep.subr.bf16.mxu1 %v2979_v15 }
 0x8c6   :  { %2547 = vmatpush3.bf16.msra.mxu1 %v2701_v39 }
 0x8c7   :  { %2566 = vmatprep.subr.bf16.mxu1 %v2979_v15 }
 0x98c   :  { %v839_v51 = vpop.f32.mrb[16].mxu1 }
 0x98d   :  { %v840_v52 = vadd.f32 %v2314_v50, %v839_v51  ;;  %v2530_v53 = vpop.f32.mrb[17].mxu1 }
 0x98e   :  { %v842_v54 = vpop.f32.mrb[18].mxu1 }
 0x98f   :  { %v843_v55 = vadd.f32 %v2314_v50, %v842_v54  ;;  %v2531_v56 = vpop.f32.mrb[19].mxu1  ;;  %v846_v57 = vadd.f32 %v840_v52, %v3241_v31 }
 0x991   :  { %v850_v49 = vsel %vm169_vm0, %v846_v57, 0.0  ;;  %v847_v58 = vadd.f32 %v843_v55, %v3243_v32  ;;  %v2696_v32 = vld [vmem:[%s3702_s24] sm:$0xff]  }
 0x992   :  { %851 = vadd.xlane.f32.xlu1 %v850_v49  ;;  %2533 = vmatpush3.bf16.msra.mxu0 %v2696_v32 }
 0x993   :  { %v853_v46 = vsel %vm169_vm0, %v847_v58, 0.0  ;;  %2534 = vmatprep.subr.bf16.mxu0 %v2979_v15 }
 0x994   :  { %854 = vadd.xlane.f32.xlu0 %v853_v46 }
 0x996   :  { %2535 = vmatpush3.bf16.msra.mxu0 %v2697_v6 }
 0x997   :  { %2552 = vmatprep.subr.bf16.mxu0 %v2979_v15 }
 0xa1f   :  { %v852_v59 = vpop.xlane.xlu1 %851 }
 0xa20   :  { %v856_v60 = vmul.f32 0.03125, %v852_v59 }
 0xa21   :  { %v855_v62 = vpop.xlane.xlu0 %854 }
 0xa22   :  { %v858_v63 = vsub.f32 %v846_v57, %v856_v60  ;;  %v857_v0 = vmul.f32 0.03125, %v855_v62 }
 0xa24   :  { %v859_v2 = vsub.f32 %v847_v58, %v857_v0  ;;  %v860_v3 = vmul.f32 %v858_v63, %v858_v63  ;;  %v2324_v58 = vld [vmem:[%s3651_s12] ss:$0 sm:$0xff] }
 0xa26   :  { %v862_v4 = vsel %vm169_vm0, %v860_v3, 0.0  ;;  %v861_v5 = vmul.f32 %v859_v2, %v859_v2 }
 0xa27   :  { %863 = vadd.xlane.f32.xlu0 %v862_v4 }
 0xa28   :  { %v865_v31 = vsel %vm169_vm0, %v861_v5, 0.0 }
 0xa2b   :  { %866 = vadd.xlane.f32.xlu0 %v865_v31 }
 0xab4   :  { %v864_v7 = vpop.xlane.xlu0 %863 }
 0xab5   :  { %v868_v8 = vmul.f32 0.03125, %v864_v7 }
 0xab7   :  { %v870_v9 = vadd.f32 1e-12, %v868_v8 }
 0xab8   :  { %v867_v10 = vpop.xlane.xlu0 %866 }
 0xab9   :  { %2737 = vrsqrt.f32 %v870_v9  ;;  %v869_v11 = vmul.f32 0.03125, %v867_v10 }
 0xabb   :  { %v871_v12 = vadd.f32 1e-12, %v869_v11 }
 0xabd   :  { %2739 = vrsqrt.f32 %v871_v12 }
 0xac3   :  { %v2738_v13 = vpop.eup %2737 }
 0xac4   :  { %v874_v14 = vmul.f32 %v2738_v13, %v858_v63 }
 0xac6   :  { %v882_v42 = vmul.f32 %v2318_v16, %v874_v14  ;;  %v2702_v14 = vld [vmem:[%s3699_s7 + $0x10] sm:$0xff]  }
 0xac7   :  { %v2740_v17 = vpop.eup %2739 }
 0xac8   :  { %v875_v18 = vmul.f32 %v2740_v17, %v859_v2  ;;  %v890_v21 = vadd.f32 %v2319_v19, %v882_v42 }
 0xaca   :  { %v883_v20 = vmul.f32 %v2318_v16, %v875_v18  ;;  %v2703_v16 = vld [vmem:[%s3699_s7 + $0x18] sm:$0xff]  }
 0xacc   :  { %v891_v22 = vadd.f32 %v2319_v19, %v883_v20 }
 0xace   :  { %v897_v23 = vpack.c.bf16 %v891_v22, %v890_v21 }
 0xad0   :  { %2537 = vmatmul.mubr.msk.bf16.vlgmr.msra.gmra.mrb[20].mxu0 %vm169_vm0, %v897_v23  ;;  %v2330_v23 = vld [vmem:[%s3652_s13] ss:$0 sm:$0xff] }
 0xad1   :  { %2556 = vmatprep.mubr.msk.bf16.mxu0 %vm2980_vm1, %v2979_v15  ;;  %2553 = vmatpush3.bf16.msra.mxu0 %v2702_v14 }
 0xad2   :  { %2554 = vmatprep.subr.bf16.mxu0 %v2979_v15 }
 0xad5   :  { %2555 = vmatpush3.bf16.msra.mxu0 %v2703_v16 }
 0xad6   :  { %2560 = vmatprep.subr.bf16.mxu0 %v2979_v15 }
 0xba3   :  { %v953_v28 = vpop.f32.mrb[20].mxu0 }
 0xba4   :  { %v954_v29 = vadd.f32 %v2320_v27, %v953_v28  ;;  %v2538_v30 = vpop.f32.mrb[21].mxu0 }
 0xba5   :  { %v956_v33 = vpop.f32.mrb[22].mxu0 }
 0xba6   :  { %v962_v34 = vmul.f32 0.044715, %v954_v29  ;;  %v957_v35 = vadd.f32 %v2320_v27, %v956_v33  ;;  %v2539_v36 = vpop.f32.mrb[23].mxu0  ;;  %v960_v53 = vmul.f32 0.5, %v954_v29  ;;  %v2331_v27 = vld [vmem:[%s3653_s14] ss:$0 sm:$0xff] }
 0xba8   :  { %v964_v37 = vmul.f32 %v962_v34, %v954_v29  ;;  %v963_v38 = vmul.f32 0.044715, %v957_v35  ;;  %v961_v54 = vmul.f32 0.5, %v957_v35  ;;  %v2336_v34 = vld [vmem:[#allocation5 + $0x1] ss:$0 sm:$0xff] }
 0xbaa   :  { %v966_v40 = vmul.f32 %v964_v37, %v954_v29  ;;  %v965_v41 = vmul.f32 %v963_v38, %v957_v35 }
 0xbac   :  { %v968_v43 = vadd.f32 %v966_v40, %v954_v29  ;;  %v967_v44 = vmul.f32 %v965_v41, %v957_v35 }
 0xbae   :  { %v970_v45 = vmul.f32 0.7978846, %v968_v43  ;;  %v969_v47 = vadd.f32 %v967_v44, %v957_v35 }
 0xbb0   :  { %2741 = vtanh.f32 %v970_v45  ;;  %v971_v48 = vmul.f32 0.7978846, %v969_v47 }
 0xbb2   :  { %2743 = vtanh.f32 %v971_v48 }
 0xbba   :  { %v2742_v50 = vpop.eup %2741 }
 0xbbb   :  { %v974_v51 = vadd.f32 1.0, %v2742_v50 }
 0xbbc   :  { %v2744_v52 = vpop.eup %2743 }
 0xbbd   :  { %v975_v55 = vadd.f32 1.0, %v2744_v52  ;;  %v976_v56 = vmul.f32 %v974_v51, %v960_v53 }
 0xbbf   :  { %v977_v57 = vmul.f32 %v975_v55, %v961_v54 }
 0xbc1   :  { %v987_v49 = vpack.c.bf16 %v977_v57, %v976_v56 }
 0xbc3   :  { %2549 = vmatmul.mubr.msk.bf16.vlgmr.msra.gmra.mrb[20].mxu1 %vm1018_vm5, %v987_v49 }
 0xbc4   :  { %2568 = vmatprep.mubr.msk.bf16.mxu1 %vm2980_vm1, %v2979_v15 }
 0xc96   :  { %v1056_v46 = vpop.f32.mrb[20].mxu1 }
 0xc97   :  { %v1057_v59 = vadd.f32 %v2324_v58, %v1056_v46  ;;  %v2550_v60 = vpop.f32.mrb[21].mxu1 }
 0xc98   :  { %v1059_v62 = vpop.f32.mrb[22].mxu1 }
 0xc99   :  { %v1060_v63 = vadd.f32 %v2324_v58, %v1059_v62  ;;  %v2551_v0 = vpop.f32.mrb[23].mxu1  ;;  %v1063_v2 = vadd.f32 %v1057_v59, %v890_v21 }
 0xc9b   :  { %v1067_v3 = vsel %vm169_vm0, %v1063_v2, 0.0  ;;  %v1064_v4 = vadd.f32 %v1060_v63, %v891_v22 }
 0xc9c   :  { %1068 = vadd.xlane.f32.xlu1 %v1067_v3 }
 0xc9d   :  { %v1070_v5 = vsel %vm169_vm0, %v1064_v4, 0.0 }
 0xc9e   :  { %1071 = vadd.xlane.f32.xlu0 %v1070_v5 }
 0xd29   :  { %v1069_v31 = vpop.xlane.xlu1 %1068 }
 0xd2a   :  { %v1073_v32 = vmul.f32 0.03125, %v1069_v31 }
 0xd2b   :  { %v1072_v6 = vpop.xlane.xlu0 %1071 }
 0xd2c   :  { %v1075_v7 = vsub.f32 %v1063_v2, %v1073_v32  ;;  %v1074_v8 = vmul.f32 0.03125, %v1072_v6 }
 0xd2e   :  { %v1076_v9 = vsub.f32 %v1064_v4, %v1074_v8  ;;  %v1077_v10 = vmul.f32 %v1075_v7, %v1075_v7 }
 0xd30   :  { %v1079_v11 = vsel %vm169_vm0, %v1077_v10, 0.0  ;;  %v1078_v12 = vmul.f32 %v1076_v9, %v1076_v9 }
 0xd31   :  { %1080 = vadd.xlane.f32.xlu1 %v1079_v11 }
 0xd32   :  { %v1082_v13 = vsel %vm169_vm0, %v1078_v12, 0.0 }
 0xd33   :  { %1083 = vadd.xlane.f32.xlu0 %v1082_v13 }
 0xdbe   :  { %v1081_v17 = vpop.xlane.xlu1 %1080 }
 0xdbf   :  { %v1085_v42 = vmul.f32 0.03125, %v1081_v17 }
 0xdc0   :  { %v1084_v18 = vpop.xlane.xlu0 %1083 }
 0xdc1   :  { %v1087_v19 = vadd.f32 1e-12, %v1085_v42  ;;  %v1086_v20 = vmul.f32 0.03125, %v1084_v18 }
 0xdc3   :  { %2745 = vrsqrt.f32 %v1087_v19  ;;  %v1088_v21 = vadd.f32 1e-12, %v1086_v20 }
 0xdc5   :  { %2747 = vrsqrt.f32 %v1088_v21 }
 0xdcd   :  { %v2746_v22 = vpop.eup %2745 }
 0xdce   :  { %v1091_v24 = vmul.f32 %v2746_v22, %v1075_v7 }
 0xdcf   :  { %v2748_v25 = vpop.eup %2747 }
 0xdd0   :  { %v1099_v26 = vmul.f32 %v2330_v23, %v1091_v24  ;;  %v1092_v39 = vmul.f32 %v2748_v25, %v1076_v9 }
 0xdd2   :  { %v1100_v28 = vmul.f32 %v2330_v23, %v1092_v39  ;;  %v3412_v29 = vadd.f32 %v2331_v27, %v1099_v26 }
 0xdd4   :  { %v3414_v30 = vadd.f32 %v2331_v27, %v1100_v28 }
 0xdd6   :  { %v1116_v33 = vpack.c.bf16 %v3414_v30, %v3412_v29 }
 0xdd8   :  { %2557 = vmatmul.mubr.msk.bf16.vlgmr.msra.gmra.mrb[24].mxu0 %vm169_vm0, %v1116_v33 }
 0xdd9   :  { %2562 = vmatprep.mubr.msk.bf16.mxu0 %vm2980_vm1, %v2979_v15 }
 0xeab   :  { %v1172_v35 = vpop.f32.mrb[24].mxu0 }
 0xeac   :  { %v1173_v36 = vadd.f32 %v2336_v34, %v1172_v35  ;;  %v2558_v37 = vpop.f32.mrb[25].mxu0 }
 0xead   :  { %v1175_v38 = vpop.f32.mrb[26].mxu0 }
 0xeae   :  { %v3421_v40 = vpack.c.bf16 %v1173_v36, %v1173_v36  ;;  %v1176_v41 = vadd.f32 %v2336_v34, %v1175_v38  ;;  %v2559_v43 = vpop.f32.mrb[27].mxu0 }
 0xeb0   :  { %v3423_v44 = vpack.c.bf16 %v1176_v41, %v1176_v41  ;;  %1182 = vrot.lane.b32.xlu1 %v3421_v40, %s2981_s15 }
 0xeb2   :  { %1231 = vrot.lane.b32.xlu0 %v3423_v44, %s2981_s15 }
 0xf22   :  { %v1183_v45 = vpop.permute.xlu1 %1182 }
 0xf23   :  { %v1188_v47 = vsel %vm289_vm2, %v1183_v45, 0 }
 0xf24   :  { %2561 = vmatpush3.bf16.xpose.msra.mxu0 %v1188_v47  ;;  %v1232_v48 = vpop.permute.xlu0 %1231 }
 0xf25   :  { %v1237_v50 = vsel %vm289_vm2, %v1232_v48, 0  ;;  %2572 = vmatprep.subr.bf16.mxu0 %v2979_v15 }
 0xf26   :  { %2567 = vmatpush3.bf16.xpose.msra.mxu1 %v1237_v50 }
 0xf27   :  { %2578 = vmatprep.subr.bf16.mxu1 %v2979_v15 }
 0xf2b   :  { %2563 = vmatmul.mubr.msk.bf16.vlgmr.msra.gmra.mrb[28].mxu0 %vm289_vm2, %v3421_v40 }
 0xf2c   :  { %2574 = vmatprep.mubr.msk.bf16.mxu0 %vm2980_vm1, %v2979_v15 }
 0xf2d   :  { %2569 = vmatmul.mubr.msk.bf16.vlgmr.msra.gmra.mrb[24].mxu1 %vm289_vm2, %v3423_v44 }
 0xf2e   :  { %2580 = vmatprep.mubr.msk.bf16.mxu1 %vm2980_vm1, %v2979_v15 }
 0xffe   :  { %v1224_v51 = vpop.f32.mrb[28].mxu0 }
 0xfff   :  { %v1279_v52 = vmul.f32 0.25, %v1224_v51  ;;  %v2564_v53 = vpop.f32.mrb[29].mxu0 }
0x1000   :  { %v1227_v54 = vpop.f32.mrb[30].mxu0  ;;  %v1273_v55 = vpop.f32.mrb[24].mxu1 }
0x1001   :  { %v1280_v56 = vmul.f32 0.25, %v1273_v55  ;;  %v2565_v57 = vpop.f32.mrb[31].mxu0  ;;  %v2570_v49 = vpop.f32.mrb[25].mxu1  ;;  %v1281_v58 = vadd.f32 %v1279_v52, %v3273_v61 }
0x1002   :  { %v1276_v46 = vpop.f32.mrb[26].mxu1 }
0x1003   :  { %v2571_v59 = vpop.f32.mrb[27].mxu1  ;;  %v1283_v60 = vsel %vm422_vm3, %v1281_v58, -inf  ;;  %v1282_v62 = vadd.f32 %v1280_v56, %v3275_v1 }
0x1004   :  { %1284 = vmax.xlane.f32.xlu1 %v1283_v60 }
0x1005   :  { %v1286_v63 = vsel %vm422_vm3, %v1282_v62, -inf }
0x1006   :  { %1287 = vmax.xlane.f32.xlu0 %v1286_v63 }
0x1015   :  { %1307 = vrot.lane.b32.xlu1 %v3421_v40, %s2983_s8 }
0x1091   :  { %v1285_v0 = vpop.xlane.xlu1 %1284 }
0x1092   :  { %v1289_v2 = vsub.f32 %v1281_v58, %v1285_v0 }
0x1093   :  { %v1288_v3 = vpop.xlane.xlu0 %1287 }
0x1094   :  { %v1291_v4 = vmul.f32 1.442695, %v1289_v2  ;;  %v1290_v5 = vsub.f32 %v1282_v62, %v1288_v3 }
0x1095   :  { %v1308_v31 = vpop.permute.xlu1 %1307 }
0x1096   :  { %2749 = vpow2.f32 %v1291_v4  ;;  %v1293_v32 = vmul.f32 1.442695, %v1290_v5  ;;  %v1313_v6 = vsel %vm452_vm4, %v1308_v31, 0 }
0x1097   :  { %2573 = vmatpush3.bf16.msra.mxu0 %v1313_v6 }
0x1098   :  { %2751 = vpow2.f32 %v1293_v32  ;;  %2584 = vmatprep.subr.bf16.mxu0 %v2979_v15 }
0x10a0   :  { %v2750_v7 = vpop.eup %2749 }
0x10a1   :  { %v1295_v8 = vsel %vm422_vm3, %v2750_v7, 0.0 }
0x10a2   :  { %v2752_v9 = vpop.eup %2751  ;;  %1296 = vadd.xlane.f32.xlu1 %v1295_v8 }
0x10a3   :  { %v1298_v10 = vsel %vm422_vm3, %v2752_v9, 0.0 }
0x10a4   :  { %1299 = vadd.xlane.f32.xlu0 %v1298_v10  ;;  %v2704_v10 = vld [vmem:[%s3701_s10 + $0x10] sm:$0xff]  }
0x10b3   :  { %1405 = vrot.lane.b32.xlu1 %v3421_v40, %s2984_s0 }
0x10b7   :  { %1455 = vrot.lane.b32.xlu1 %v3423_v44, %s2984_s0 }
0x10ba   :  { %1355 = vrot.lane.b32.xlu0 %v3423_v44, %s2983_s8 }
0x10bb   :  { %1403 = vrot.lane.b32.xlu1 %v3421_v40, %s2985_s3 }
0x10be   :  { %1453 = vrot.lane.b32.xlu0 %v3423_v44, %s2985_s3 }
0x112f   :  { %v1297_v11 = vpop.xlane.xlu1 %1296 }
0x1130   :  { %2753 = vrcp.f32 %v1297_v11  ;;  %v2705_v11 = vld [vmem:[%s3701_s10 + $0x18] sm:$0xff]  }
0x1131   :  { %v1300_v12 = vpop.xlane.xlu0 %1299 }
0x1132   :  { %2755 = vrcp.f32 %v1300_v12 }
0x1133   :  { %v1406_v16 = vpop.permute.xlu1 %1405 }
0x1134   :  { %v1411_v22 = vsel %vm289_vm2, %v1406_v16, 0 }
0x1135   :  { %v1356_v13 = vpop.permute.xlu0 %1355 }
0x1136   :  { %v1361_v14 = vsel %vm452_vm4, %v1356_v13, 0 }
0x1137   :  { %2579 = vmatpush3.bf16.msra.mxu1 %v1361_v14  ;;  %v1456_v21 = vpop.permute.xlu1 %1455 }
0x1138   :  { %2590 = vmatprep.subr.bf16.mxu1 %v2979_v15  ;;  %v1461_v24 = vsel %vm289_vm2, %v1456_v21, 0 }
0x1139   :  { %v1454_v26 = vpop.permute.xlu0 %1453 }
0x113a   :  { %v2754_v17 = vpop.eup %2753 }
0x113b   :  { %v1303_v42 = vmul.f32 %v2754_v17, %v2750_v7  ;;  %v1404_v25 = vpop.permute.xlu1 %1403 }
0x113c   :  { %v2756_v18 = vpop.eup %2755 }
0x113d   :  { %v1304_v19 = vmul.f32 %v2756_v18, %v2752_v9  ;;  %v1305_v20 = vpack.c.bf16 %v1303_v42, %v1303_v42 }
0x113f   :  { %2575 = vmatmul.mubr.msk.bf16.vlgmr.msra.gmra.mrb[32].mxu0 %vm422_vm3, %v1305_v20  ;;  %v1306_v23 = vpack.c.bf16 %v1304_v19, %v1304_v19 }
0x1140   :  { %2585 = vmatpush3.bf16.xpose.msra.mxu0 %v1411_v22  ;;  %2586 = vmatprep.mubr.msk.bf16.mxu0 %vm2980_vm1, %v2979_v15 }
0x1141   :  { %2581 = vmatmul.mubr.msk.bf16.vlgmr.msra.gmra.mrb[28].mxu1 %vm422_vm3, %v1306_v23  ;;  %2596 = vmatprep.subr.bf16.mxu0 %v2979_v15 }
0x1142   :  { %2591 = vmatpush3.bf16.xpose.msra.mxu1 %v1461_v24  ;;  %2592 = vmatprep.mubr.msk.bf16.mxu1 %vm2980_vm1, %v2979_v15 }
0x1143   :  { %2602 = vmatprep.subr.bf16.mxu1 %v2979_v15 }
0x1147   :  { %2587 = vmatmul.mubr.msk.bf16.vlgmr.msra.gmra.mrb[36].mxu0 %vm289_vm2, %v1404_v25 }
0x1148   :  { %2598 = vmatprep.mubr.msk.bf16.mxu0 %vm2980_vm1, %v2979_v15 }
0x1149   :  { %2593 = vmatmul.mubr.msk.bf16.vlgmr.msra.gmra.mrb[32].mxu1 %vm289_vm2, %v1454_v26 }
0x114a   :  { %2604 = vmatprep.mubr.msk.bf16.mxu1 %vm2980_vm1, %v2979_v15 }
0x1212   :  { %v3479_v39 = vpop.f32.mrb[32].mxu0 }
0x1213   :  { %v2576_v27 = vpop.f32.mrb[33].mxu0 }
0x1214   :  { %v1352_v28 = vpop.f32.mrb[34].mxu0  ;;  %v3481_v33 = vpop.f32.mrb[28].mxu1  ;;  %v2352_v27 = vld [vmem:[#allocation7 + $0x1] ss:$0 sm:$0xff] }
0x1215   :  { %v2577_v34 = vpop.f32.mrb[35].mxu0  ;;  %v2582_v35 = vpop.f32.mrb[29].mxu1 }
0x1216   :  { %v1400_v36 = vpop.f32.mrb[30].mxu1 }
0x1217   :  { %v2583_v37 = vpop.f32.mrb[31].mxu1 }
0x121a   :  { %v1447_v38 = vpop.f32.mrb[36].mxu0 }
0x121b   :  { %v1503_v41 = vmul.f32 0.25, %v1447_v38  ;;  %v2588_v43 = vpop.f32.mrb[37].mxu0 }
0x121c   :  { %v1450_v45 = vpop.f32.mrb[38].mxu0  ;;  %v1497_v47 = vpop.f32.mrb[32].mxu1 }
0x121d   :  { %v1504_v48 = vmul.f32 0.25, %v1497_v47  ;;  %v2589_v50 = vpop.f32.mrb[39].mxu0  ;;  %v2594_v51 = vpop.f32.mrb[33].mxu1  ;;  %v1505_v52 = vadd.f32 %v1503_v41, %v3273_v61 }
0x121e   :  { %v1500_v53 = vpop.f32.mrb[34].mxu1 }
0x121f   :  { %v2595_v54 = vpop.f32.mrb[35].mxu1  ;;  %v1507_v55 = vsel %vm422_vm3, %v1505_v52, -inf  ;;  %v1506_v56 = vadd.f32 %v1504_v48, %v3275_v1 }
0x1220   :  { %1508 = vmax.xlane.f32.xlu1 %v1507_v55 }
0x1221   :  { %v1510_v57 = vsel %vm422_vm3, %v1506_v56, -inf }
0x1222   :  { %1511 = vmax.xlane.f32.xlu0 %v1510_v57 }
0x1231   :  { %1531 = vrot.lane.b32.xlu1 %v3421_v40, %s2986_s1 }
0x12ad   :  { %v1509_v49 = vpop.xlane.xlu1 %1508 }
0x12ae   :  { %v1513_v58 = vsub.f32 %v1505_v52, %v1509_v49 }
0x12af   :  { %v1512_v46 = vpop.xlane.xlu0 %1511 }
0x12b0   :  { %v1515_v59 = vmul.f32 1.442695, %v1513_v58  ;;  %v1514_v60 = vsub.f32 %v1506_v56, %v1512_v46  ;;  %v2707_v56 = vld [vmem:[%s3702_s24 + $0x18] sm:$0xff]  }
0x12b1   :  { %v1532_v62 = vpop.permute.xlu1 %1531 }
0x12b2   :  { %2757 = vpow2.f32 %v1515_v59  ;;  %v1517_v61 = vmul.f32 1.442695, %v1514_v60  ;;  %v1537_v63 = vsel %vm452_vm4, %v1532_v62, 0 }
0x12b3   :  { %2597 = vmatpush3.bf16.msra.mxu0 %v1537_v63 }
0x12b4   :  { %2759 = vpow2.f32 %v1517_v61  ;;  %2608 = vmatprep.subr.bf16.mxu0 %v2979_v15  ;;  %v2356_v61 = vld [vmem:[#allocation8 + $0x1] ss:$0 sm:$0xff] }
0x12bc   :  { %v2758_v1 = vpop.eup %2757 }
0x12bd   :  { %v1519_v0 = vsel %vm422_vm3, %v2758_v1, 0.0 }
0x12be   :  { %v2760_v2 = vpop.eup %2759  ;;  %1520 = vadd.xlane.f32.xlu0 %v1519_v0 }
0x12bf   :  { %v1522_v40 = vsel %vm422_vm3, %v2760_v2, 0.0 }
0x12c2   :  { %1523 = vadd.xlane.f32.xlu0 %v1522_v40  ;;  %v2357_v40 = vld [vmem:[#allocation10 + $0x1] ss:$0 sm:$0xff] }
0x12d8   :  { %1579 = vrot.lane.b32.xlu0 %v3423_v44, %s2986_s1 }
0x134b   :  { %v1521_v3 = vpop.xlane.xlu0 %1520 }
0x134c   :  { %2761 = vrcp.f32 %v1521_v3 }
0x134f   :  { %v1524_v4 = vpop.xlane.xlu0 %1523 }
0x1350   :  { %2763 = vrcp.f32 %v1524_v4 }
0x1353   :  { %v1580_v5 = vpop.permute.xlu0 %1579 }
0x1354   :  { %v1585_v31 = vsel %vm452_vm4, %v1580_v5, 0 }
0x1355   :  { %2603 = vmatpush3.bf16.msra.mxu1 %v1585_v31 }
0x1356   :  { %v2762_v32 = vpop.eup %2761  ;;  %2616 = vmatprep.subr.bf16.mxu1 %v2979_v15 }
0x1357   :  { %v1527_v6 = vmul.f32 %v2762_v32, %v2758_v1  ;;  %v2708_v32 = vld [vmem:[%s3650_s11 + $0x20] sm:$0xff]  }
0x1359   :  { %v1529_v7 = vpack.c.bf16 %v1527_v6, %v1527_v6  ;;  %v2709_v6 = vld [vmem:[%s3650_s11 + $0x28] sm:$0xff]  }
0x135a   :  { %v2764_v8 = vpop.eup %2763 }
0x135b   :  { %v1528_v9 = vmul.f32 %v2764_v8, %v2760_v2  ;;  %2599 = vmatmul.mubr.msk.bf16.vlgmr.msra.gmra.mrb[40].mxu0 %vm422_vm3, %v1529_v7  ;;  %v2710_v7 = vld [vmem:[%s3650_s11 + $0x30] sm:$0xff]   ;;  %v2711_v8 = vld [vmem:[%s3650_s11 + $0x38] sm:$0xff]  }
0x135c   :  { %2612 = vmatprep.mubr.msk.bf16.mxu0 %vm2980_vm1, %v2979_v15  ;;  %2609 = vmatpush3.bf16.msra.mxu0 %v2704_v10 }
0x135d   :  { %v1530_v44 = vpack.c.bf16 %v1528_v9, %v1528_v9  ;;  %2610 = vmatprep.subr.bf16.mxu0 %v2979_v15  ;;  %v2362_v9 = vld [vmem:[#allocation11 + $0x1] ss:$0 sm:$0xff] }
0x135f   :  { %2605 = vmatmul.mubr.msk.bf16.vlgmr.msra.gmra.mrb[36].mxu1 %vm422_vm3, %v1530_v44 }
0x1360   :  { %2620 = vmatprep.mubr.msk.bf16.mxu1 %vm2980_vm1, %v2979_v15  ;;  %2611 = vmatpush3.bf16.msra.mxu0 %v2705_v11 }
0x1361   :  { %2624 = vmatprep.subr.bf16.mxu0 %v2979_v15 }
0x142e   :  { %v1573_v12 = vpop.f32.mrb[40].mxu0 }
0x142f   :  { %v2600_v13 = vpop.f32.mrb[41].mxu0 }
0x1430   :  { %v1576_v14 = vpop.f32.mrb[42].mxu0 }
0x1431   :  { %v2601_v16 = vpop.f32.mrb[43].mxu0 }
0x1432   :  { %v1621_v17 = vpop.f32.mrb[36].mxu1 }
0x1433   :  { %v2687_v42 = vpack.i.bf16 %v1621_v17, %v1573_v12  ;;  %v2606_v18 = vpop.f32.mrb[37].mxu1 }
0x1434   :  { %v1624_v19 = vpop.f32.mrb[38].mxu1 }
0x1435   :  { %v2607_v20 = vpop.f32.mrb[39].mxu1  ;;  %2688 = vrot.lane.b32.xlu1 %v2687_v42, %s2972_s5 }
0x14a7   :  { %v2689_v21 = vpop.permute.xlu1 %2688 }
0x14a8   :  { %v2691_v22 = vunpack.i.h.bf16 %v2689_v21  ;;  %v2690_v23 = vunpack.i.l.bf16 %v2689_v21 }
0x14aa   :  { %v1636_v24 = vsel %vm289_vm2, %v3481_v33, %v2691_v22  ;;  %v1635_v25 = vsel %vm289_vm2, %v3479_v39, %v2690_v23 }
0x14ab   :  { %v1644_v26 = vpack.c.bf16 %v1636_v24, %v1635_v25 }
0x14ad   :  { %2613 = vmatmul.mubr.msk.bf16.vlgmr.msra.gmra.mrb[44].mxu0 %vm169_vm0, %v1644_v26 }
0x14ae   :  { %2632 = vmatprep.mubr.msk.bf16.mxu0 %vm2980_vm1, %v2979_v15  ;;  %2625 = vmatpush3.bf16.msra.mxu0 %v2708_v32  ;;  %v2384_v32 = vld [vmem:[%s3653_s14 + $0x1] ss:$0 sm:$0xff] }
0x14af   :  { %2626 = vmatprep.subr.bf16.mxu0 %v2979_v15 }
0x14b2   :  { %2627 = vmatpush3.bf16.msra.mxu0 %v2709_v6 }
0x14b3   :  { %2628 = vmatprep.subr.bf16.mxu0 %v2979_v15 }
0x14b6   :  { %2629 = vmatpush3.bf16.msra.mxu0 %v2710_v7 }
0x14b7   :  { %2630 = vmatprep.subr.bf16.mxu0 %v2979_v15 }
0x14ba   :  { %2631 = vmatpush3.bf16.msra.mxu0 %v2711_v8 }
0x14bb   :  { %2652 = vmatprep.subr.bf16.mxu0 %v2979_v15 }
0x1580   :  { %v1700_v28 = vpop.f32.mrb[44].mxu0 }
0x1581   :  { %v1701_v34 = vadd.f32 %v2352_v27, %v1700_v28  ;;  %v2614_v35 = vpop.f32.mrb[45].mxu0 }
0x1582   :  { %v1703_v36 = vpop.f32.mrb[46].mxu0 }
0x1583   :  { %v1704_v37 = vadd.f32 %v2352_v27, %v1703_v36  ;;  %v2615_v38 = vpop.f32.mrb[47].mxu0  ;;  %v1707_v41 = vadd.f32 %v1701_v34, %v3412_v29 }
0x1585   :  { %v1713_v33 = vsel %vm169_vm0, %v1707_v41, 0.0  ;;  %v1708_v43 = vadd.f32 %v1704_v37, %v3414_v30  ;;  %v2706_v30 = vld [vmem:[%s3702_s24 + $0x10] sm:$0xff]  }
0x1586   :  { %1714 = vadd.xlane.f32.xlu1 %v1713_v33  ;;  %2617 = vmatpush3.bf16.msra.mxu1 %v2706_v30 }
0x1587   :  { %v1716_v39 = vsel %vm169_vm0, %v1708_v43, 0.0  ;;  %2618 = vmatprep.subr.bf16.mxu1 %v2979_v15 }
0x1588   :  { %1717 = vadd.xlane.f32.xlu0 %v1716_v39 }
0x158a   :  { %2619 = vmatpush3.bf16.msra.mxu1 %v2707_v56 }
0x158b   :  { %2636 = vmatprep.subr.bf16.mxu1 %v2979_v15 }
0x1613   :  { %v1715_v45 = vpop.xlane.xlu1 %1714 }
0x1614   :  { %v1719_v47 = vmul.f32 0.03125, %v1715_v45 }
0x1615   :  { %v1718_v48 = vpop.xlane.xlu0 %1717 }
0x1616   :  { %v1721_v50 = vsub.f32 %v1707_v41, %v1719_v47  ;;  %v1720_v51 = vmul.f32 0.03125, %v1718_v48  ;;  %v2375_v41 = vld [vmem:[%s3651_s12 + $0x1] ss:$0 sm:$0xff] }
0x1618   :  { %v1722_v52 = vsub.f32 %v1708_v43, %v1720_v51  ;;  %v1723_v53 = vmul.f32 %v1721_v50, %v1721_v50 }
0x161a   :  { %v1725_v54 = vsel %vm169_vm0, %v1723_v53, 0.0  ;;  %v1724_v55 = vmul.f32 %v1722_v52, %v1722_v52 }
0x161b   :  { %1726 = vadd.xlane.f32.xlu0 %v1725_v54 }
0x161c   :  { %v1728_v29 = vsel %vm169_vm0, %v1724_v55, 0.0 }
0x161d   :  { %1729 = vadd.xlane.f32.xlu1 %v1728_v29 }
0x16a8   :  { %v1727_v57 = vpop.xlane.xlu0 %1726 }
0x16a9   :  { %v1731_v49 = vmul.f32 0.03125, %v1727_v57 }
0x16aa   :  { %v1730_v58 = vpop.xlane.xlu1 %1729 }
0x16ab   :  { %v1733_v46 = vadd.f32 1e-12, %v1731_v49  ;;  %v1732_v59 = vmul.f32 0.03125, %v1730_v58 }
0x16ad   :  { %2765 = vrsqrt.f32 %v1733_v46  ;;  %v1734_v60 = vadd.f32 1e-12, %v1732_v59 }
0x16af   :  { %2767 = vrsqrt.f32 %v1734_v60  ;;  %v2712_v60 = vld [vmem:[%s3656_s17] sm:$0xff]  }
0x16b7   :  { %v2766_v62 = vpop.eup %2765 }
0x16b8   :  { %v1737_v63 = vmul.f32 %v2766_v62, %v1721_v50  ;;  %v2713_v62 = vld [vmem:[%s3656_s17 + $0x8] sm:$0xff]  }
0x16b9   :  { %v2768_v1 = vpop.eup %2767 }
0x16ba   :  { %v1745_v0 = vmul.f32 %v2356_v61, %v1737_v63  ;;  %v1738_v2 = vmul.f32 %v2768_v1, %v1722_v52 }
0x16bc   :  { %v1746_v3 = vmul.f32 %v2356_v61, %v1738_v2  ;;  %v1753_v4 = vadd.f32 %v2357_v40, %v1745_v0 }
0x16be   :  { %v1754_v5 = vadd.f32 %v2357_v40, %v1746_v3 }
0x16c0   :  { %v1762_v31 = vpack.c.bf16 %v1754_v5, %v1753_v4 }
0x16c2   :  { %2621 = vmatmul.mubr.msk.bf16.vlgmr.msra.gmra.mrb[40].mxu1 %vm169_vm0, %v1762_v31 }
0x16c3   :  { %2640 = vmatprep.mubr.msk.bf16.mxu1 %vm2980_vm1, %v2979_v15  ;;  %2637 = vmatpush3.bf16.msra.mxu1 %v2712_v60 }
0x16c4   :  { %2638 = vmatprep.subr.bf16.mxu1 %v2979_v15 }
0x16c7   :  { %2639 = vmatpush3.bf16.msra.mxu1 %v2713_v62 }
0x16c8   :  { %2644 = vmatprep.subr.bf16.mxu1 %v2979_v15 }
0x1795   :  { %v1818_v44 = vpop.f32.mrb[40].mxu1 }
0x1796   :  { %v1819_v10 = vadd.f32 %v2362_v9, %v1818_v44  ;;  %v2622_v11 = vpop.f32.mrb[41].mxu1 }
0x1797   :  { %v1821_v12 = vpop.f32.mrb[42].mxu1 }
0x1798   :  { %v1827_v13 = vmul.f32 0.044715, %v1819_v10  ;;  %v1822_v14 = vadd.f32 %v2362_v9, %v1821_v12  ;;  %v2623_v16 = vpop.f32.mrb[43].mxu1  ;;  %v1825_v28 = vmul.f32 0.5, %v1819_v10 }
0x179a   :  { %v1829_v17 = vmul.f32 %v1827_v13, %v1819_v10  ;;  %v1828_v42 = vmul.f32 0.044715, %v1822_v14  ;;  %v1826_v34 = vmul.f32 0.5, %v1822_v14 }
0x179c   :  { %v1831_v18 = vmul.f32 %v1829_v17, %v1819_v10  ;;  %v1830_v19 = vmul.f32 %v1828_v42, %v1822_v14  ;;  %v2714_v42 = vld [vmem:[%s3658_s19] sm:$0xff]  }
0x179e   :  { %v1833_v20 = vadd.f32 %v1831_v18, %v1819_v10  ;;  %v1832_v21 = vmul.f32 %v1830_v19, %v1822_v14  ;;  %v2715_v18 = vld [vmem:[%s3658_s19 + $0x8] sm:$0xff]   ;;  %v2385_v19 = vld [vmem:[%s3657_s18] ss:$0 sm:$0xff] }
0x17a0   :  { %v1835_v22 = vmul.f32 0.7978846, %v1833_v20  ;;  %v1834_v23 = vadd.f32 %v1832_v21, %v1822_v14 }
0x17a2   :  { %2769 = vtanh.f32 %v1835_v22  ;;  %v1836_v24 = vmul.f32 0.7978846, %v1834_v23 }
0x17a4   :  { %2771 = vtanh.f32 %v1836_v24 }
0x17ac   :  { %v2770_v25 = vpop.eup %2769 }
0x17ad   :  { %v1839_v26 = vadd.f32 1.0, %v2770_v25 }
0x17ae   :  { %v2772_v27 = vpop.eup %2771 }
0x17af   :  { %v1840_v35 = vadd.f32 1.0, %v2772_v27  ;;  %v1841_v36 = vmul.f32 %v1839_v26, %v1825_v28  ;;  %v2716_v27 = vld [vmem:[%s3660_s21] sm:$0xff]  }
0x17b0   :  { %v2389_v28 = vld [vmem:[%s3659_s20] ss:$0 sm:$0xff] }
0x17b1   :  { %v1842_v37 = vmul.f32 %v1840_v35, %v1826_v34 }
0x17b3   :  { %v1854_v38 = vpack.c.bf16 %v1842_v37, %v1841_v36 }
0x17b5   :  { %2633 = vmatmul.mubr.msk.bf16.vlgmr.msra.gmra.mrb[48].mxu0 %vm1018_vm5, %v1854_v38 }
0x17b6   :  { %2654 = vmatprep.mubr.msk.bf16.mxu0 %vm2980_vm1, %v2979_v15  ;;  %2653 = vmatpush3.bf16.msra.mxu0 %v2716_v27 }
0x1888   :  { %v1922_v33 = vpop.f32.mrb[48].mxu0 }
0x1889   :  { %v1923_v43 = vadd.f32 %v2375_v41, %v1922_v33  ;;  %v2634_v39 = vpop.f32.mrb[49].mxu0 }
0x188a   :  { %v1925_v45 = vpop.f32.mrb[50].mxu0  ;;  %v2393_v39 = vld [vmem:[%s3661_s22] ss:$0 sm:$0xff]  ;;  %s2987_s22 = smov [#allocation13]  }
0x188b   :  { %v1926_v47 = vadd.f32 %v2375_v41, %v1925_v45  ;;  %v2635_v48 = vpop.f32.mrb[51].mxu0  ;;  %v1929_v50 = vadd.f32 %v1923_v43, %v1753_v4  ;;  %v2383_v4 = vld [vmem:[%s3652_s13 + $0x1] ss:$0 sm:$0xff] }
0x188d   :  { %v1935_v51 = vsel %vm169_vm0, %v1929_v50, 0.0  ;;  %v1930_v52 = vadd.f32 %v1926_v47, %v1754_v5 }
0x188e   :  { %1936 = vadd.xlane.f32.xlu1 %v1935_v51 }
0x188f   :  { %v1938_v53 = vsel %vm169_vm0, %v1930_v52, 0.0 }
0x1890   :  { %1939 = vadd.xlane.f32.xlu0 %v1938_v53 }
0x191b   :  { %v1937_v54 = vpop.xlane.xlu1 %1936 }
0x191c   :  { %v1941_v55 = vmul.f32 0.03125, %v1937_v54  ;;  %v2396_v54 = vld [vmem:[%s3703_s16] ss:$0 sm:$0xff] }
0x191d   :  { %v1940_v29 = vpop.xlane.xlu0 %1939 }
0x191e   :  { %v1943_v30 = vsub.f32 %v1929_v50, %v1941_v55  ;;  %v1942_v56 = vmul.f32 0.03125, %v1940_v29 }
0x1920   :  { %v1944_v57 = vsub.f32 %v1930_v52, %v1942_v56  ;;  %v1945_v49 = vmul.f32 %v1943_v30, %v1943_v30 }
0x1922   :  { %v1947_v58 = vsel %vm169_vm0, %v1945_v49, 0.0  ;;  %v1946_v46 = vmul.f32 %v1944_v57, %v1944_v57 }
0x1923   :  { %1948 = vadd.xlane.f32.xlu1 %v1947_v58 }
0x1924   :  { %v1950_v59 = vsel %vm169_vm0, %v1946_v46, 0.0 }
0x1925   :  { %1951 = vadd.xlane.f32.xlu0 %v1950_v59 }
0x19b0   :  { %v1949_v61 = vpop.xlane.xlu1 %1948 }
0x19b1   :  { %v1953_v63 = vmul.f32 0.03125, %v1949_v61 }
0x19b2   :  { %v1952_v1 = vpop.xlane.xlu0 %1951 }
0x19b3   :  { %v1955_v0 = vadd.f32 1e-12, %v1953_v63  ;;  %v1954_v2 = vmul.f32 0.03125, %v1952_v1 }
0x19b5   :  { %2773 = vrsqrt.f32 %v1955_v0  ;;  %v1956_v40 = vadd.f32 1e-12, %v1954_v2  ;;  %v2250_v0 = vld [vmem:[#allocation2] sm:$0x3] }
0x19b7   :  { %2775 = vrsqrt.f32 %v1956_v40 }
0x19bf   :  { %v2774_v3 = vpop.eup %2773 }
0x19c0   :  { %v1959_v5 = vmul.f32 %v2774_v3, %v1943_v30 }
0x19c1   :  { %v2776_v31 = vpop.eup %2775 }
0x19c2   :  { %v1967_v6 = vmul.f32 %v2383_v4, %v1959_v5  ;;  %v1960_v7 = vmul.f32 %v2776_v31, %v1944_v57 }
0x19c4   :  { %v1975_v8 = vadd.f32 %v2384_v32, %v1967_v6  ;;  %v1968_v9 = vmul.f32 %v2383_v4, %v1960_v7 }
0x19c6   :  { %v1976_v44 = vadd.f32 %v2384_v32, %v1968_v9  ;;  %v1982_v10 = vpack.c.bf16 %v1975_v8, %v1975_v8 }
0x19c8   :  { %v1983_v11 = vpack.c.bf16 %v1976_v44, %v1976_v44  ;;  %v1992_v13 = vunpack.c.l.b16 %v1982_v10 }
0x19ca   :  { %v1993_v12 = vunpack.c.l.b16 %v1983_v11 }
0x19cc   :  { %v1994_v14 = vrot.slane %v1993_v12, 7 }
0x19ce   :  { %v1996_v16 = vsel %vm1995_vm6, %v1994_v14, %v1992_v13 }
0x19cf   :  { %v1997_v17 = vpack.c.b16 %v1996_v16, %v1996_v16 }
0x19d1   :  { %2641 = vmatmul.mubr.msk.bf16.vlgmr.msra.gmra.mrb[44].mxu1 %vm169_vm0, %v1997_v17 }
0x19d2   :  { %2648 = vmatprep.mubr.msk.bf16.mxu1 %vm2980_vm1, %v2979_v15  ;;  %2645 = vmatpush3.bf16.msra.mxu1 %v2714_v42 }
0x19d3   :  { %2646 = vmatprep.subr.bf16.mxu1 %v2979_v15 }
0x19d6   :  { %2647 = vmatpush3.bf16.msra.mxu1 %v2715_v18 }
0x19d7   :  { %2658 = vmatprep.subr.bf16.mxu1 %v2979_v15 }
0x1aa4   :  { %v2047_v20 = vpop.f32.mrb[44].mxu1 }
0x1aa5   :  { %v2048_v21 = vadd.f32 %v2385_v19, %v2047_v20  ;;  %v2642_v22 = vpop.f32.mrb[45].mxu1 }
0x1aa6   :  { %v2050_v23 = vpop.f32.mrb[46].mxu1 }
0x1aa7   :  { %2777 = vtanh.f32 %v2048_v21  ;;  %v2643_v24 = vpop.f32.mrb[47].mxu1 }
0x1ab1   :  { %v2778_v25 = vpop.eup %2777 }
0x1ab2   :  { %v2059_v26 = vpack.c.bf16 %v2778_v25, %v2778_v25 }
0x1ab4   :  { %2649 = vmatmul.mubr.msk.bf16.vlgmr.msra.gmra.mrb[48].mxu1 %vm169_vm0, %v2059_v26 }
0x1ab5   :  { %2660 = vmatprep.mubr.msk.bf16.mxu1 %vm2980_vm1, %v2979_v15  ;;  %v2182_v15 = vld [vmem:[%s3662_s23] sm:$0xf]  ;;  %s2274_s23 = sshll.u32 %s2987_s22, 4  ;;  %s2275_s23 = int_to_ptr.vmem [resolvable:$true] %s2274_s23 }
0x1ab6   :  { %v2195_v43 = vsel %vm452_vm4, %v2182_v15, 0  ;;  %s2915_s29 = scalar_lea.vmem %s2275_s23, 32  ;;  %p2920_p7 = scmp.lt.s32.totalorder %s2275_s23, %s2275_s23 }
0x1ab7   :  { %2659 = vmatpush3.bf16.msra.mxu1 %v2195_v43  ;;  %p2916_p6 = scmp.ne.s32.totalorder %s2275_s23, %s2915_s29  ;;  %p2921_p8 = scmp.lt.s32.totalorder %s2915_s29, %s2915_s29 }
0x1ab9   :  { %p2922_p9 = por %p2921_p8, %p2920_p7 }
0x1abb   :  { %p2923_p10 = pnand %p2922_p9, %p2916_p6 }
0x1b87   :  { %v2115_v34 = vpop.f32.mrb[48].mxu1 }
0x1b88   :  { %v2116_v35 = vadd.f32 %v2389_v28, %v2115_v34  ;;  %v2650_v36 = vpop.f32.mrb[49].mxu1 }
0x1b89   :  { %v2118_v37 = vpop.f32.mrb[50].mxu1 }
0x1b8a   :  { %v2121_v38 = vmax.f32 %v2116_v35, 0.0  ;;  %v2651_v41 = vpop.f32.mrb[51].mxu1 }
0x1b8c   :  { %v2125_v33 = vpack.c.bf16 %v2121_v38, %v2121_v38 }
0x1b8e   :  { %2655 = vmatmul.mubr.msk.bf16.vlgmr.msra.gmra.mrb[52].mxu0 %vm289_vm2, %v2125_v33 }
0x1c61   :  { %v2175_v45 = vpop.f32.mrb[52].mxu0 }
0x1c62   :  { %v2176_v47 = vadd.f32 %v2393_v39, %v2175_v45  ;;  %v2656_v48 = vpop.f32.mrb[53].mxu0 }
0x1c63   :  { %v2178_v50 = vpop.f32.mrb[54].mxu0 }
0x1c64   :  { %v2181_v51 = vmax.f32 %v2176_v47, 0.0  ;;  %v2657_v52 = vpop.f32.mrb[55].mxu0 }
0x1c66   :  { %v2184_v53 = vpack.c.bf16 %v2181_v51, %v2181_v51 }
0x1c68   :  { %2661 = vmatmul.mubr.msk.bf16.vlgmr.msra.gmra.mrb[52].mxu1 %vm422_vm3, %v2184_v53 }
0x1d3b   :  { %v2231_v55 = vpop.f32.mrb[52].mxu1 }
0x1d3c   :  { %v2232_v29 = vadd.f32 %v2396_v54, %v2231_v55  ;;  %v2662_v30 = vpop.f32.mrb[53].mxu1 }
0x1d3d   :  { %v2234_v56 = vpop.f32.mrb[54].mxu1 }
0x1d3e   :  { %v2663_v57 = vpop.f32.mrb[55].mxu1  ;;  %v2239_v49 = vsel %vm2237_vm7, %v2232_v29, -inf  ;;  %2238 = vst.msk [vmem:[#allocation13] sm:$0x3] %vm2237_vm7, %v2232_v29 }
0x1d3f   :  { %2240 = vmax.xlane.f32.xlu0 %v2239_v49 }
0x1dcc   :  { %v2241_v58 = vpop.xlane.xlu0 %2240 }
0x1dcd   :  { %v2242_v46 = vsub.f32 %v2232_v29, %v2241_v58 }
0x1dcf   :  { %v2243_v59 = vmul.f32 1.442695, %v2242_v46 }
0x1dd1   :  { %2779 = vpow2.f32 %v2243_v59 }
0x1ddb   :  { %v2780_v60 = vpop.eup %2779 }
0x1ddc   :  { %v2245_v62 = vsel %vm2237_vm7, %v2780_v60, 0.0 }
0x1ddd   :  { %2246 = vadd.xlane.f32.xlu1 %v2245_v62 }
0x1e6a   :  { %v2247_v61 = vpop.xlane.xlu1 %2246 }
0x1e6b   :  { %2781 = vlog2.f32 %v2247_v61 }
0x1e75   :  { %v2782_v63 = vpop.eup %2781 }
0x1e76   :  { %v2249_v1 = vmul.f32 0.6931472, %v2782_v63 }
0x1e78   :  { %v2251_v2 = vsub.f32 %v2242_v46, %v2249_v1 }
0x1e7a   :  { %v2252_v40 = vmul.f32 %v2251_v2, %v2250_v0 }
0x1e7c   :  { %v2253_v3 = vsel %vm2237_vm7, %v2252_v40, 0.0 }
0x1e7d   :  { %2254 = vadd.xlane.f32.xlu0 %v2253_v3 }
0x1e7e   :  { %2926 = shalt.err (!%p2923_p10)
}
0x1e7f   :  { %s3704_s30 = sld [smem:[#allocation34_spill]] }
0x1e85   :  { %s2927_s12 = scalar_lea.hbm %s3704_s30, 32 }
0x1e86   :  { %p2928_p11 = scmp.ne.s32.totalorder %s3704_s30, %s2927_s12  ;;  %p2931_p12 = scmp.lt.u32.totalorder %s2927_s12, %s3704_s30 }
0x1e88   :  { %p2933_p13 = pnand %p2931_p12, %p2928_p11 }
0x1e8a   :  { %2936 = shalt.err (!%p2933_p13)
}
0x1e8b   :  { %2277 = dma.vmem_to_hbm [thread:$0]  %s2275_s23, 32, %s3704_s30, [#allocation4]   ;;  %vm2257_vm8 = vcmask 1041408   ;;  %vm2266_vm9 = vcmask 0  }
0x1e8c   :  { %s2988_s0 = smov [#allocation14]  }
0x1e8d   :  { %s2284_s13 = sshll.u32 %s2988_s0, 4  ;;  %s2285_s13 = int_to_ptr.vmem [resolvable:$true] %s2284_s13 }
0x1e8e   :  { %s2937_s14 = scalar_lea.vmem %s2285_s13, 16  ;;  %s2941_s3 = scalar_lea.vmem %s2285_s13, 32 }
0x1e8f   :  { %p2938_p0 = scmp.ne.s32.totalorder %s2285_s13, %s2937_s14  ;;  %p2942_p1 = scmp.lt.s32.totalorder %s2285_s13, %s2285_s13 }
0x1e90   :  { %p2943_p2 = scmp.lt.s32.totalorder %s2941_s3, %s2937_s14 }
0x1e92   :  { %p2944_p3 = por %p2943_p2, %p2942_p1 }
0x1e94   :  { %p2945_p4 = pnand %p2944_p3, %p2938_p0 }
0x1f0a   :  { %v2255_v4 = vpop.xlane.xlu0 %2254 }
0x1f0b   :  { %v2256_v5 = vsub.f32 0.0, %v2255_v4 }
0x1f0d   :  { %v2258_v31 = vsel %vm2257_vm8, %v2256_v5, 0.0 }
0x1f0e   :  { %v2259_v32 = vrot.slane %v2258_v31, 4 }
0x1f10   :  { %v2260_v6 = vadd.f32 %v2259_v32, %v2258_v31 }
0x1f12   :  { %v2261_v7 = vrot.slane %v2260_v6, 2 }
0x1f14   :  { %v2262_v8 = vadd.f32 %v2261_v7, %v2260_v6 }
0x1f16   :  { %v2263_v9 = vrot.slane %v2262_v8, 1 }
0x1f18   :  { %v2264_v44 = vadd.f32 %v2263_v9, %v2262_v8 }
0x1f1a   :  { %v2265_v10 = vmul.f32 0.5, %v2264_v44 }
0x1f1c   :  { %2267 = vst.msk [vmem:[#allocation14] sm:$0x1] %vm2266_vm9, %v2265_v10 }
0x1f1d   :  { %2948 = shalt.err (!%p2945_p4)
}
0x1f1e   :  { %s3705_s10 = sld [smem:[#allocation35_spill]] }
0x1f24   :  { %s2949_s19 = scalar_lea.hbm %s3705_s10, 16 }
0x1f25   :  { %p2950_p5 = scmp.ne.s32.totalorder %s3705_s10, %s2949_s19  ;;  %p2953_p6 = scmp.lt.u32.totalorder %s2949_s19, %s3705_s10 }
0x1f27   :  { %p2955_p7 = pnand %p2953_p6, %p2950_p5 }
0x1f29   :  { %2958 = shalt.err (!%p2955_p7)
}
0x1f2a   :  { %2287 = dma.vmem_to_hbm [thread:$0]  %s2285_s13, 16, %s3705_s10, [#allocation15]  }
0x1f2b   :  { %2967 = dma.done.wait [#allocation4], 32  }
0x1f2c   :  { %2968 = vsyncadd [#allocation4], 4294967264 }
0x1f2d   :  { %2969 = dma.done.wait [#allocation15], 16  }
0x1f2e   :  { %2970 = vsyncadd [#allocation15], 4294967280 }
0x1f2f   :  { %2294 = vsyncpa [#allocation3], 1 }
0x1f30   :  { %2295 = vsyncpa [#allocation6], 1 }
0x1f31   :  { %2296 = vsyncpa [#allocation9], 1 }
0x1f32   :  { %2297 = vsyncpa [#allocation12], 1 }
0x1f33   :  { %2298 = vsyncpa [#allocation4], 1 }
0x1f34   :  { %2299 = vsyncpa [#allocation15], 1 }

</bundles_post_ra>
